<compile_context>
chip_gen: v6e
topology: v6e:2x2x1
jax: 0.10.0
libtpu: 0.0.40
codegen_flags: <defaults>
</compile_context>

<pallas_src>
import jax
import jax.numpy as jnp
import numpy as np
from jax.experimental import pallas as pl
from jax.experimental.pallas import tpu as pltpu

NUM_TYPES = 24


def mctne_kernel(s_ref, t_ref, h_ref, n_ref, side_ref, out_ref):
    s = s_ref[...]               # (E, Bb)
    t = t_ref[...]               # (E, Bb)
    h = h_ref[...]               # (H, E, Bb)
    n = n_ref[...]               # (N, E, Bb)

    att_score   = side_ref[0]    # (H, Bb)  precomputed logits att_param[s][h_type]
    h_times     = side_ref[1]    # (H, Bb)
    h_t_time    = side_ref[2]    # (H, Bb)
    h_time_mask = side_ref[3]    # (H, Bb)
    h_t_masks   = side_ref[4]    # (H, Bb)
    delta       = side_ref[5]    # (H, Bb)  delta[s] broadcast over H
    t_time      = side_ref[6]    # (H, Bb)  t_times broadcast over H

    # softmax over the history axis (sublanes); reciprocal goes to the EUP slot.
    m = jnp.max(att_score, axis=0, keepdims=True)
    e = jnp.exp(att_score - m)
    inv_sum = pl.reciprocal(jnp.sum(e, axis=0, keepdims=True), approx=True)
    att = e * inv_sum                                     # (H, Bb)
    # NOTE: att_p (from att_param_p) never affects the torch forward's outputs.

    # squared norms & dot products (contract over E, the sublane axis)
    hh = jnp.sum(h * h, axis=1)                           # (H, Bb)
    nn = jnp.sum(n * n, axis=1)                           # (N, Bb)
    ss = jnp.sum(s * s, axis=0, keepdims=True)            # (1, Bb)
    tt = jnp.sum(t * t, axis=0, keepdims=True)            # (1, Bb)
    st = jnp.sum(s * t, axis=0, keepdims=True)            # (1, Bb)
    ht = jnp.sum(h * t[None], axis=1)                     # (H, Bb)
    hs = jnp.sum(h * s[None], axis=1)                     # (H, Bb)
    sn = jnp.sum(n * s[None], axis=1)                     # (N, Bb)
    tn = jnp.sum(n * t[None], axis=1)                     # (N, Bb)

    p_mu      = -(ss + tt - 2.0 * st)                     # (1, Bb)
    p_alpha   = -(hh + tt - 2.0 * ht)                     # (H, Bb)
    p_t_alpha = -(hh + ss - 2.0 * hs)                     # (H, Bb)
    n_mu      = -(ss + nn - 2.0 * sn)                     # (N, Bb)
    n_t_alpha = -(tt + nn - 2.0 * tn)                     # (N, Bb)

    d_time   = jnp.abs(t_time - h_times)                  # (H, Bb)
    d_t_time = jnp.abs(t_time - h_t_time)                 # (H, Bb)
    exp_dt   = jnp.exp(delta * d_time)
    exp_dtt  = jnp.exp(delta * d_t_time)

    # positive lambda (mask pairing matches the torch forward)
    a = p_alpha * exp_dt * h_t_masks
    b = p_t_alpha * exp_dtt * h_time_mask
    p_lambda = p_mu + jnp.sum(att * (a + b), axis=0, keepdims=True)   # (1, Bb)

    # negative lambda: fold the history reduction into an attention-weighted
    # history embedding so no (H, N, *) intermediate is ever built:
    #   sum_h w_h ||h_h - n||^2 = sum_h w_h||h_h||^2 + ||n||^2 sum_h w_h
    #                             - 2 <sum_h w_h h_h, n>
    w    = att * exp_dt * h_time_mask                     # (H, Bb)
    w_s  = jnp.sum(w, axis=0, keepdims=True)              # (1, Bb)
    w_hh = jnp.sum(w * hh, axis=0, keepdims=True)         # (1, Bb)
    s_tt = jnp.sum(att * exp_dtt, axis=0, keepdims=True)  # (1, Bb)
    hw   = jnp.sum(h * w[:, None, :], axis=0)             # (E, Bb)
    hw_n = jnp.sum(n * hw[None], axis=1)                  # (N, Bb)
    n_lambda = n_mu - w_hh - nn * w_s + 2.0 * hw_n + n_t_alpha * s_tt  # (N, Bb)

    out_ref[0:1, :] = p_lambda
    out_ref[1:, :] = n_lambda


def mctne_forward(node_emb, delta_param, att_param, att_param_p,
                  idx, s_nodes, t_nodes, t_times, n_nodes, h_nodes,
                  h_times, h_types, h_t_time, h_time_mask, h_t_masks,
                  *, block_b=128):
    # att_param_p only feeds att_p, which the torch forward never uses in its
    # returned (p_lambda, n_lambda); omitted from the kernel.
    del att_param_p
    B = s_nodes.shape[0]
    H = h_nodes.shape[1]
    N = n_nodes.shape[1]
    E = node_emb.shape[-1]
    f32 = jnp.float32

    # ---- gather glue (XLA) -------------------------------------------------
    emb = node_emb[idx]                                   # (node_dim, E)
    s_emb = emb[s_nodes]                                  # (B, E)
    t_emb = emb[t_nodes]                                  # (B, E)
    h_emb = emb[h_nodes]                                  # (B, H, E)
    n_emb = emb[n_nodes]                                  # (B, N, E)
    h_types_i = h_types.astype(jnp.int32)
    # one_hot(h_types, 24) . att_param[s]  ==  per-history gather of the logit
    att_score = jnp.take_along_axis(att_param[s_nodes], h_types_i, axis=1)  # (B,H)
    delta_s = delta_param[s_nodes].astype(f32)            # (B,)
    tt = t_times.astype(f32)                              # (B,)

    # ---- batch-last (lane-dense) relayout ----------------------------------
    s_t = s_emb.T.astype(f32)                             # (E, B)
    t_t = t_emb.T.astype(f32)                             # (E, B)
    h_t = jnp.transpose(h_emb, (1, 2, 0)).astype(f32)     # (H, E, B)
    n_t = jnp.transpose(n_emb, (1, 2, 0)).astype(f32)     # (N, E, B)
    side = jnp.stack(                                     # (7, H, B) single DMA
        [att_score.T.astype(f32),
         h_times.T.astype(f32),
         h_t_time.T.astype(f32),
         h_time_mask.T.astype(f32),
         h_t_masks.T.astype(f32),
         jnp.broadcast_to(delta_s[None, :], (H, B)),
         jnp.broadcast_to(tt[None, :], (H, B))],
        axis=0)

    # ---- batch tiling: lane-dense blocks, pad B if needed -------------------
    # block_b=128 keeps lanes full and (for realistic B) >=2 grid steps so the
    # batch axis can be sharded across v7x's 2 TensorCores; raise block_b for
    # bigger tiles on v5e/v6e if desired (per-step VMEM is only a few 100 KB).
    bb = min(block_b, B)
    b_pad = ((B + bb - 1) // bb) * bb

    def pad_last(x):
        if b_pad == B:
            return x
        return jnp.pad(x, [(0, 0)] * (x.ndim - 1) + [(0, b_pad - B)])

    s_t, t_t, h_t, n_t, side = map(pad_last, (s_t, t_t, h_t, n_t, side))
    grid = (b_pad // bb,)

    out = pl.pallas_call(
        mctne_kernel,
        grid=grid,
        in_specs=[
            pl.BlockSpec((E, bb), lambda i: (0, i)),          # s_emb (E,B)
            pl.BlockSpec((E, bb), lambda i: (0, i)),          # t_emb (E,B)
            pl.BlockSpec((H, E, bb), lambda i: (0, 0, i)),    # h_emb (H,E,B)
            pl.BlockSpec((N, E, bb), lambda i: (0, 0, i)),    # n_emb (N,E,B)
            pl.BlockSpec((7, H, bb), lambda i: (0, 0, i)),    # packed side inputs
        ],
        out_specs=pl.BlockSpec((1 + N, bb), lambda i: (0, i)),  # packed output
        out_shape=jax.ShapeDtypeStruct((1 + N, b_pad), f32),
        compiler_params=pltpu.CompilerParams(
            dimension_semantics=("parallel",)),
    )(s_t, t_t, h_t, n_t, side)

    p_lambda = out[0, :B]            # (B,)
    n_lambda = out[1:, :B].T         # (B, N)
    return p_lambda, n_lambda


def mctne_forward_ref(node_emb, delta_param, att_param, att_param_p,
                      idx, s_nodes, t_nodes, t_times, n_nodes, h_nodes,
                      h_times, h_types, h_t_time, h_time_mask, h_t_masks):
    """Plain-JAX reference mirroring the PyTorch forward (CUDA branch)."""
    B = s_nodes.shape[0]
    H = h_nodes.shape[1]
    N = n_nodes.shape[1]
    E = node_emb.shape[-1]
    emb = node_emb[idx]
    s = emb[s_nodes]
    t = emb[t_nodes]
    h = emb[h_nodes.reshape(-1)].reshape(B, H, E)
    n = emb[n_nodes.reshape(-1)].reshape(B, N, E)
    onehot = jax.nn.one_hot(h_types.astype(jnp.int32), NUM_TYPES, dtype=jnp.float32)
    att_para = att_param[s_nodes]
    att = jax.nn.softmax(jnp.sum(onehot * att_para[:, None, :], axis=2), axis=1)
    p_mu = -jnp.sum((s - t) ** 2, axis=1)
    p_alpha = -jnp.sum((h - t[:, None, :]) ** 2, axis=2)
    p_t_alpha = -jnp.sum((h - s[:, None, :]) ** 2, axis=2)
    delta = delta_param[s_nodes][:, None]
    d_time = jnp.abs(t_times[:, None] - h_times)
    d_t_time = jnp.abs(t_times[:, None] - h_t_time)
    a = p_alpha * jnp.exp(delta * d_time) * h_t_masks
    b = p_t_alpha * jnp.exp(delta * d_t_time) * h_time_mask
    p_lambda = p_mu + jnp.sum(att * (a + b), axis=1)
    n_mu = -jnp.sum((s[:, None, :] - n) ** 2, axis=2)
    n_alpha = -jnp.sum((h[:, :, None, :] - n[:, None, :, :]) ** 2, axis=3)
    n_t_alpha = -jnp.sum((t[:, None, :] - n) ** 2, axis=2)
    a2 = n_alpha * jnp.exp(delta * d_time)[:, :, None] * h_time_mask[:, :, None]
    b2 = n_t_alpha[:, None, :] * jnp.exp(delta * d_t_time)[:, :, None]
    n_lambda = n_mu + jnp.sum(att[:, :, None] * (a2 + b2), axis=1)
    return p_lambda, n_lambda


if __name__ == "__main__":
    # Small deterministic problem sizes consistent with the module.
    snapshot_nums = 3
    node_dim = 64
    emb_size = 32
    batch = 16
    hist_len = 5
    neg_size = 5

    key = jax.random.PRNGKey(0)
    ks = jax.random.split(key, 12)
    bound = 1.0 / np.sqrt(node_dim)

    # Parameters (deterministic init mimicking __init__)
    node_emb = jax.random.uniform(ks[0], (snapshot_nums, node_dim, emb_size),
                                  minval=-bound, maxval=bound, dtype=jnp.float32)
    delta_param = jnp.ones((node_dim,), jnp.float32)
    att_param = jax.random.uniform(ks[1], (node_dim, NUM_TYPES),
                                   minval=-bound, maxval=bound, dtype=jnp.float32)
    att_param_p = jax.random.uniform(ks[2], (node_dim, NUM_TYPES),
                                     minval=-bound, maxval=bound, dtype=jnp.float32)

    # Inputs
    idx = 1
    s_nodes = jax.random.randint(ks[3], (batch,), 0, node_dim)
    t_nodes = jax.random.randint(ks[4], (batch,), 0, node_dim)
    n_nodes = jax.random.randint(ks[5], (batch, neg_size), 0, node_dim)
    h_nodes = jax.random.randint(ks[6], (batch, hist_len), 0, node_dim)
    t_times = jax.random.uniform(ks[7], (batch,), dtype=jnp.float32)
    h_times = jax.random.uniform(ks[8], (batch, hist_len), dtype=jnp.float32)
    h_t_time = jax.random.uniform(ks[9], (batch, hist_len), dtype=jnp.float32)
    h_types = jax.random.randint(ks[10], (batch, hist_len), 0, NUM_TYPES)
    mk = jax.random.split(ks[11], 2)
    h_time_mask = jax.random.bernoulli(mk[0], 0.8, (batch, hist_len)).astype(jnp.float32)
    h_t_masks = jax.random.bernoulli(mk[1], 0.8, (batch, hist_len)).astype(jnp.float32)

    args = (node_emb, delta_param, att_param, att_param_p,
            idx, s_nodes, t_nodes, t_times, n_nodes, h_nodes,
            h_times, h_types, h_t_time, h_time_mask, h_t_masks)

    p_lam, n_lam = mctne_forward(*args)
    jax.block_until_ready((p_lam, n_lam))

    p_ref, n_ref = mctne_forward_ref(*args)
    assert p_lam.shape == (batch,) and n_lam.shape == (batch, neg_size)
    # Tolerance slightly loosened vs exact-divide version: the softmax uses the
    # approximate EUP reciprocal and distances use the reassociated
    # ||x||^2+||y||^2-2x.y form; genuine bugs produce O(0.1+) discrepancies.
    np.testing.assert_allclose(np.asarray(p_lam), np.asarray(p_ref), rtol=5e-3, atol=5e-3)
    np.testing.assert_allclose(np.asarray(n_lam), np.asarray(n_ref), rtol=5e-3, atol=5e-3)

    print("KERNEL_OK")
</pallas_src>

<mosaic_0001>
module attributes {stable_mosaic.version = 11 : i64} {
  func.func @mctne_kernel(%arg0: i32, %arg1: memref<32x16xf32, #tpu.memory_space<vmem>>, %arg2: memref<32x16xf32, #tpu.memory_space<vmem>>, %arg3: memref<5x32x16xf32, #tpu.memory_space<vmem>>, %arg4: memref<5x32x16xf32, #tpu.memory_space<vmem>>, %arg5: memref<7x5x16xf32, #tpu.memory_space<vmem>>, %arg6: memref<6x16xf32, #tpu.memory_space<vmem>>) attributes {dimension_semantics = [#tpu.dimension_semantics<parallel>], iteration_bounds = array<i64: 1>, scalar_prefetch = 0 : i64, scratch_operands = 0 : i64, tpu.core_type = #tpu.core_type<tc>, window_params = [{transform_indices = @transform_0, window_bounds = array<i64: 32, 16>}, {transform_indices = @transform_1, window_bounds = array<i64: 32, 16>}, {transform_indices = @transform_2, window_bounds = array<i64: 5, 32, 16>}, {transform_indices = @transform_3, window_bounds = array<i64: 5, 32, 16>}, {transform_indices = @transform_4, window_bounds = array<i64: 7, 5, 16>}, {transform_indices = @transform_5, window_bounds = array<i64: 6, 16>}]} {
    %c0 = arith.constant 0 : index
    %c0_0 = arith.constant 0 : index
    %0 = vector.load %arg1[%c0, %c0_0] : memref<32x16xf32, #tpu.memory_space<vmem>>, vector<32x16xf32>
    %c0_1 = arith.constant 0 : index
    %c0_2 = arith.constant 0 : index
    %1 = vector.load %arg2[%c0_1, %c0_2] : memref<32x16xf32, #tpu.memory_space<vmem>>, vector<32x16xf32>
    %c0_3 = arith.constant 0 : index
    %c0_4 = arith.constant 0 : index
    %c0_5 = arith.constant 0 : index
    %2 = vector.load %arg3[%c0_3, %c0_4, %c0_5] : memref<5x32x16xf32, #tpu.memory_space<vmem>>, vector<5x32x16xf32>
    %c0_6 = arith.constant 0 : index
    %c0_7 = arith.constant 0 : index
    %c0_8 = arith.constant 0 : index
    %3 = vector.load %arg4[%c0_6, %c0_7, %c0_8] : memref<5x32x16xf32, #tpu.memory_space<vmem>>, vector<5x32x16xf32>
    %c0_9 = arith.constant 0 : index
    %c0_10 = arith.constant 0 : index
    %c0_11 = arith.constant 0 : index
    %4 = vector.load %arg5[%c0_9, %c0_10, %c0_11] : memref<7x5x16xf32, #tpu.memory_space<vmem>>, vector<1x5x16xf32>
    %5 = vector.shape_cast %4 : vector<1x5x16xf32> to vector<5x16xf32>
    %c1 = arith.constant 1 : index
    %c0_12 = arith.constant 0 : index
    %c0_13 = arith.constant 0 : index
    %6 = vector.load %arg5[%c1, %c0_12, %c0_13] : memref<7x5x16xf32, #tpu.memory_space<vmem>>, vector<1x5x16xf32>
    %7 = vector.shape_cast %6 : vector<1x5x16xf32> to vector<5x16xf32>
    %c2 = arith.constant 2 : index
    %c0_14 = arith.constant 0 : index
    %c0_15 = arith.constant 0 : index
    %8 = vector.load %arg5[%c2, %c0_14, %c0_15] : memref<7x5x16xf32, #tpu.memory_space<vmem>>, vector<1x5x16xf32>
    %9 = vector.shape_cast %8 : vector<1x5x16xf32> to vector<5x16xf32>
    %c3 = arith.constant 3 : index
    %c0_16 = arith.constant 0 : index
    %c0_17 = arith.constant 0 : index
    %10 = vector.load %arg5[%c3, %c0_16, %c0_17] : memref<7x5x16xf32, #tpu.memory_space<vmem>>, vector<1x5x16xf32>
    %11 = vector.shape_cast %10 : vector<1x5x16xf32> to vector<5x16xf32>
    %c4 = arith.constant 4 : index
    %c0_18 = arith.constant 0 : index
    %c0_19 = arith.constant 0 : index
    %12 = vector.load %arg5[%c4, %c0_18, %c0_19] : memref<7x5x16xf32, #tpu.memory_space<vmem>>, vector<1x5x16xf32>
    %13 = vector.shape_cast %12 : vector<1x5x16xf32> to vector<5x16xf32>
    %c5 = arith.constant 5 : index
    %c0_20 = arith.constant 0 : index
    %c0_21 = arith.constant 0 : index
    %14 = vector.load %arg5[%c5, %c0_20, %c0_21] : memref<7x5x16xf32, #tpu.memory_space<vmem>>, vector<1x5x16xf32>
    %15 = vector.shape_cast %14 : vector<1x5x16xf32> to vector<5x16xf32>
    %c6 = arith.constant 6 : index
    %c0_22 = arith.constant 0 : index
    %c0_23 = arith.constant 0 : index
    %16 = vector.load %arg5[%c6, %c0_22, %c0_23] : memref<7x5x16xf32, #tpu.memory_space<vmem>>, vector<1x5x16xf32>
    %17 = vector.shape_cast %16 : vector<1x5x16xf32> to vector<5x16xf32>
    %cst = arith.constant dense<0xFF800000> : vector<16xf32>
    %18 = vector.multi_reduction <maximumf>, %5, %cst [0] : vector<5x16xf32> to vector<16xf32>
    %19 = vector.shape_cast %18 : vector<16xf32> to vector<1x16xf32>
    %20 = vector.broadcast %19 : vector<1x16xf32> to vector<5x16xf32>
    %21 = arith.subf %5, %20 : vector<5x16xf32>
    %22 = math.exp %21 : vector<5x16xf32>
    %cst_24 = arith.constant dense<0.000000e+00> : vector<16xf32>
    %23 = vector.multi_reduction <add>, %22, %cst_24 [0] : vector<5x16xf32> to vector<16xf32>
    %24 = vector.shape_cast %23 : vector<16xf32> to vector<1x16xf32>
    %25 = tpu.reciprocal %24 {approx = true} : vector<1x16xf32> -> vector<1x16xf32>
    %26 = vector.broadcast %25 : vector<1x16xf32> to vector<5x16xf32>
    %27 = arith.mulf %22, %26 : vector<5x16xf32>
    %28 = arith.mulf %2, %2 : vector<5x32x16xf32>
    %cst_25 = arith.constant dense<0.000000e+00> : vector<5x16xf32>
    %29 = vector.multi_reduction <add>, %28, %cst_25 [1] : vector<5x32x16xf32> to vector<5x16xf32>
    %30 = arith.mulf %3, %3 : vector<5x32x16xf32>
    %cst_26 = arith.constant dense<0.000000e+00> : vector<5x16xf32>
    %31 = vector.multi_reduction <add>, %30, %cst_26 [1] : vector<5x32x16xf32> to vector<5x16xf32>
    %32 = arith.mulf %0, %0 : vector<32x16xf32>
    %cst_27 = arith.constant dense<0.000000e+00> : vector<16xf32>
    %33 = vector.multi_reduction <add>, %32, %cst_27 [0] : vector<32x16xf32> to vector<16xf32>
    %34 = vector.shape_cast %33 : vector<16xf32> to vector<1x16xf32>
    %35 = arith.mulf %1, %1 : vector<32x16xf32>
    %cst_28 = arith.constant dense<0.000000e+00> : vector<16xf32>
    %36 = vector.multi_reduction <add>, %35, %cst_28 [0] : vector<32x16xf32> to vector<16xf32>
    %37 = vector.shape_cast %36 : vector<16xf32> to vector<1x16xf32>
    %38 = arith.mulf %0, %1 : vector<32x16xf32>
    %cst_29 = arith.constant dense<0.000000e+00> : vector<16xf32>
    %39 = vector.multi_reduction <add>, %38, %cst_29 [0] : vector<32x16xf32> to vector<16xf32>
    %40 = vector.shape_cast %39 : vector<16xf32> to vector<1x16xf32>
    %41 = vector.shape_cast %1 : vector<32x16xf32> to vector<1x32x16xf32>
    %42 = vector.broadcast %41 : vector<1x32x16xf32> to vector<5x32x16xf32>
    %43 = arith.mulf %2, %42 : vector<5x32x16xf32>
    %cst_30 = arith.constant dense<0.000000e+00> : vector<5x16xf32>
    %44 = vector.multi_reduction <add>, %43, %cst_30 [1] : vector<5x32x16xf32> to vector<5x16xf32>
    %45 = vector.shape_cast %0 : vector<32x16xf32> to vector<1x32x16xf32>
    %46 = vector.broadcast %45 : vector<1x32x16xf32> to vector<5x32x16xf32>
    %47 = arith.mulf %2, %46 : vector<5x32x16xf32>
    %cst_31 = arith.constant dense<0.000000e+00> : vector<5x16xf32>
    %48 = vector.multi_reduction <add>, %47, %cst_31 [1] : vector<5x32x16xf32> to vector<5x16xf32>
    %49 = vector.shape_cast %0 : vector<32x16xf32> to vector<1x32x16xf32>
    %50 = vector.broadcast %49 : vector<1x32x16xf32> to vector<5x32x16xf32>
    %51 = arith.mulf %3, %50 : vector<5x32x16xf32>
    %cst_32 = arith.constant dense<0.000000e+00> : vector<5x16xf32>
    %52 = vector.multi_reduction <add>, %51, %cst_32 [1] : vector<5x32x16xf32> to vector<5x16xf32>
    %53 = vector.shape_cast %1 : vector<32x16xf32> to vector<1x32x16xf32>
    %54 = vector.broadcast %53 : vector<1x32x16xf32> to vector<5x32x16xf32>
    %55 = arith.mulf %3, %54 : vector<5x32x16xf32>
    %cst_33 = arith.constant dense<0.000000e+00> : vector<5x16xf32>
    %56 = vector.multi_reduction <add>, %55, %cst_33 [1] : vector<5x32x16xf32> to vector<5x16xf32>
    %57 = arith.addf %34, %37 : vector<1x16xf32>
    %cst_34 = arith.constant 2.000000e+00 : f32
    %58 = vector.broadcast %cst_34 : f32 to vector<1x16xf32>
    %59 = arith.mulf %58, %40 : vector<1x16xf32>
    %60 = arith.subf %57, %59 : vector<1x16xf32>
    %cst_35 = arith.constant 0.000000e+00 : f32
    %61 = vector.broadcast %cst_35 : f32 to vector<1x16xf32>
    %62 = arith.subf %61, %60 : vector<1x16xf32>
    %63 = vector.broadcast %37 : vector<1x16xf32> to vector<5x16xf32>
    %64 = arith.addf %29, %63 : vector<5x16xf32>
    %cst_36 = arith.constant 2.000000e+00 : f32
    %65 = vector.broadcast %cst_36 : f32 to vector<5x16xf32>
    %66 = arith.mulf %65, %44 : vector<5x16xf32>
    %67 = arith.subf %64, %66 : vector<5x16xf32>
    %cst_37 = arith.constant 0.000000e+00 : f32
    %68 = vector.broadcast %cst_37 : f32 to vector<5x16xf32>
    %69 = arith.subf %68, %67 : vector<5x16xf32>
    %70 = vector.broadcast %34 : vector<1x16xf32> to vector<5x16xf32>
    %71 = arith.addf %29, %70 : vector<5x16xf32>
    %cst_38 = arith.constant 2.000000e+00 : f32
    %72 = vector.broadcast %cst_38 : f32 to vector<5x16xf32>
    %73 = arith.mulf %72, %48 : vector<5x16xf32>
    %74 = arith.subf %71, %73 : vector<5x16xf32>
    %cst_39 = arith.constant 0.000000e+00 : f32
    %75 = vector.broadcast %cst_39 : f32 to vector<5x16xf32>
    %76 = arith.subf %75, %74 : vector<5x16xf32>
    %77 = vector.broadcast %34 : vector<1x16xf32> to vector<5x16xf32>
    %78 = arith.addf %77, %31 : vector<5x16xf32>
    %cst_40 = arith.constant 2.000000e+00 : f32
    %79 = vector.broadcast %cst_40 : f32 to vector<5x16xf32>
    %80 = arith.mulf %79, %52 : vector<5x16xf32>
    %81 = arith.subf %78, %80 : vector<5x16xf32>
    %cst_41 = arith.constant 0.000000e+00 : f32
    %82 = vector.broadcast %cst_41 : f32 to vector<5x16xf32>
    %83 = arith.subf %82, %81 : vector<5x16xf32>
    %84 = vector.broadcast %37 : vector<1x16xf32> to vector<5x16xf32>
    %85 = arith.addf %84, %31 : vector<5x16xf32>
    %cst_42 = arith.constant 2.000000e+00 : f32
    %86 = vector.broadcast %cst_42 : f32 to vector<5x16xf32>
    %87 = arith.mulf %86, %56 : vector<5x16xf32>
    %88 = arith.subf %85, %87 : vector<5x16xf32>
    %cst_43 = arith.constant 0.000000e+00 : f32
    %89 = vector.broadcast %cst_43 : f32 to vector<5x16xf32>
    %90 = arith.subf %89, %88 : vector<5x16xf32>
    %91 = arith.subf %17, %7 : vector<5x16xf32>
    %92 = math.absf %91 : vector<5x16xf32>
    %93 = arith.subf %17, %9 : vector<5x16xf32>
    %94 = math.absf %93 : vector<5x16xf32>
    %95 = arith.mulf %15, %92 : vector<5x16xf32>
    %96 = math.exp %95 : vector<5x16xf32>
    %97 = arith.mulf %15, %94 : vector<5x16xf32>
    %98 = math.exp %97 : vector<5x16xf32>
    %99 = arith.mulf %69, %96 : vector<5x16xf32>
    %100 = arith.mulf %99, %13 : vector<5x16xf32>
    %101 = arith.mulf %76, %98 : vector<5x16xf32>
    %102 = arith.mulf %101, %11 : vector<5x16xf32>
    %103 = arith.addf %100, %102 : vector<5x16xf32>
    %104 = arith.mulf %27, %103 : vector<5x16xf32>
    %cst_44 = arith.constant dense<0.000000e+00> : vector<16xf32>
    %105 = vector.multi_reduction <add>, %104, %cst_44 [0] : vector<5x16xf32> to vector<16xf32>
    %106 = vector.shape_cast %105 : vector<16xf32> to vector<1x16xf32>
    %107 = arith.addf %62, %106 : vector<1x16xf32>
    %108 = arith.mulf %27, %96 : vector<5x16xf32>
    %109 = arith.mulf %108, %11 : vector<5x16xf32>
    %cst_45 = arith.constant dense<0.000000e+00> : vector<16xf32>
    %110 = vector.multi_reduction <add>, %109, %cst_45 [0] : vector<5x16xf32> to vector<16xf32>
    %111 = vector.shape_cast %110 : vector<16xf32> to vector<1x16xf32>
    %112 = arith.mulf %109, %29 : vector<5x16xf32>
    %cst_46 = arith.constant dense<0.000000e+00> : vector<16xf32>
    %113 = vector.multi_reduction <add>, %112, %cst_46 [0] : vector<5x16xf32> to vector<16xf32>
    %114 = vector.shape_cast %113 : vector<16xf32> to vector<1x16xf32>
    %115 = arith.mulf %27, %98 : vector<5x16xf32>
    %cst_47 = arith.constant dense<0.000000e+00> : vector<16xf32>
    %116 = vector.multi_reduction <add>, %115, %cst_47 [0] : vector<5x16xf32> to vector<16xf32>
    %117 = vector.shape_cast %116 : vector<16xf32> to vector<1x16xf32>
    %118 = vector.shape_cast %109 : vector<5x16xf32> to vector<5x1x16xf32>
    %119 = vector.broadcast %118 : vector<5x1x16xf32> to vector<5x32x16xf32>
    %120 = arith.mulf %2, %119 : vector<5x32x16xf32>
    %cst_48 = arith.constant dense<0.000000e+00> : vector<32x16xf32>
    %121 = vector.multi_reduction <add>, %120, %cst_48 [0] : vector<5x32x16xf32> to vector<32x16xf32>
    %122 = vector.shape_cast %121 : vector<32x16xf32> to vector<1x32x16xf32>
    %123 = vector.broadcast %122 : vector<1x32x16xf32> to vector<5x32x16xf32>
    %124 = arith.mulf %3, %123 : vector<5x32x16xf32>
    %cst_49 = arith.constant dense<0.000000e+00> : vector<5x16xf32>
    %125 = vector.multi_reduction <add>, %124, %cst_49 [1] : vector<5x32x16xf32> to vector<5x16xf32>
    %126 = vector.broadcast %114 : vector<1x16xf32> to vector<5x16xf32>
    %127 = arith.subf %83, %126 : vector<5x16xf32>
    %128 = vector.broadcast %111 : vector<1x16xf32> to vector<5x16xf32>
    %129 = arith.mulf %31, %128 : vector<5x16xf32>
    %130 = arith.subf %127, %129 : vector<5x16xf32>
    %cst_50 = arith.constant 2.000000e+00 : f32
    %131 = vector.broadcast %cst_50 : f32 to vector<5x16xf32>
    %132 = arith.mulf %131, %125 : vector<5x16xf32>
    %133 = arith.addf %130, %132 : vector<5x16xf32>
    %134 = vector.broadcast %117 : vector<1x16xf32> to vector<5x16xf32>
    %135 = arith.mulf %90, %134 : vector<5x16xf32>
    %136 = arith.addf %133, %135 : vector<5x16xf32>
    %c0_51 = arith.constant 0 : index
    %c0_52 = arith.constant 0 : index
    %137 = vector.load %arg6[%c0_51, %c0_52] : memref<6x16xf32, #tpu.memory_space<vmem>>, vector<1x16xf32>
    tpu.vector_store %arg6[%c0_51, %c0_52], %107 {strides = array<i32>} : memref<6x16xf32, #tpu.memory_space<vmem>>, vector<1x16xf32>,
    %c1_53 = arith.constant 1 : index
    %c0_54 = arith.constant 0 : index
    %138 = vector.load %arg6[%c1_53, %c0_54] : memref<6x16xf32, #tpu.memory_space<vmem>>, vector<5x16xf32>
    tpu.vector_store %arg6[%c1_53, %c0_54], %136 {strides = array<i32>} : memref<6x16xf32, #tpu.memory_space<vmem>>, vector<5x16xf32>,
    return
  }
  func.func @transform_0(%arg0: i32) -> (i32, i32) {
    %c0_i32 = arith.constant 0 : i32
    %c0_i32_0 = arith.constant 0 : i32
    return %c0_i32, %arg0 : i32, i32
  }
  func.func @transform_1(%arg0: i32) -> (i32, i32) {
    %c0_i32 = arith.constant 0 : i32
    %c0_i32_0 = arith.constant 0 : i32
    return %c0_i32, %arg0 : i32, i32
  }
  func.func @transform_2(%arg0: i32) -> (i32, i32, i32) {
    %c0_i32 = arith.constant 0 : i32
    %c0_i32_0 = arith.constant 0 : i32
    %c0_i32_1 = arith.constant 0 : i32
    return %c0_i32, %c0_i32_0, %arg0 : i32, i32, i32
  }
  func.func @transform_3(%arg0: i32) -> (i32, i32, i32) {
    %c0_i32 = arith.constant 0 : i32
    %c0_i32_0 = arith.constant 0 : i32
    %c0_i32_1 = arith.constant 0 : i32
    return %c0_i32, %c0_i32_0, %arg0 : i32, i32, i32
  }
  func.func @transform_4(%arg0: i32) -> (i32, i32, i32) {
    %c0_i32 = arith.constant 0 : i32
    %c0_i32_0 = arith.constant 0 : i32
    %c0_i32_1 = arith.constant 0 : i32
    return %c0_i32, %c0_i32_0, %arg0 : i32, i32, i32
  }
  func.func @transform_5(%arg0: i32) -> (i32, i32) {
    %c0_i32 = arith.constant 0 : i32
    %c0_i32_0 = arith.constant 0 : i32
    return %c0_i32, %arg0 : i32, i32
  }
}

</mosaic_0001>

<bundles_post_ra>
// kernel: tpu_custom_call.1
= control target key start
LH: loop header
LB: loop body
LE: loop exit
PB: predicated region body
PF: predicated region fallthrough
CT: control target
= control target key end

     0   :  { %10 = vsyncpa [#allocation3], 0  ;;  %vm122_vm0 = vcmask 130048   ;;  %vm82_vm1 = vcmask 126976   ;;  %vm713_vm2 = vcmask 1041409   ;;  %vm715_vm3 = vcmask 1042434   ;;  %s2412_s0 = inlined_call_operand.vmem [shape: f32[32,16], index: 0, kind: input, shape index: {}]   ;;  %s2413_s1 = inlined_call_operand.vmem [shape: f32[32,16], index: 1, kind: input, shape index: {}]   ;;  %s2414_s2 = inlined_call_operand.vmem [shape: f32[5,32,16], index: 2, kind: input, shape index: {}]   ;;  %s2415_s3 = inlined_call_operand.vmem [shape: f32[5,32,16], index: 3, kind: input, shape index: {}]   ;;  %s2416_s4 = inlined_call_operand.vmem [shape: f32[7,5,16], index: 4, kind: input, shape index: {}]   ;;  %s2417_s5 = inlined_call_operand.hbm [shape: f32[6,16], index: 5, kind: output, shape index: {}]  }
   0x1   :  { %v1266_v0 = vld [vmem:[%s2414_s2] sm:$0xff]  ;;  %v1271_v1 = vld [vmem:[%s2414_s2 + $0x8] sm:$0xff]  ;;  %v1276_v2 = vld [vmem:[%s2414_s2 + $0x10] sm:$0xff]  ;;  %vm717_vm4 = vcmask 1043459   ;;  %vm719_vm5 = vcmask 1044484   ;;  %vm1136_vm6 = vcmask 122880  }
   0x2   :  { %v102_v3 = vmul.f32 %v1266_v0, %v1266_v0  ;;  %v103_v4 = vmul.f32 %v1271_v1, %v1271_v1  ;;  %v1285_v5 = vld [vmem:[%s2414_s2 + $0x20] sm:$0xff]  ;;  %v1290_v6 = vld [vmem:[%s2414_s2 + $0x28] sm:$0xff]  ;;  %v104_v9 = vmul.f32 %v1276_v2, %v1276_v2  ;;  %v1307_v10 = vld [vmem:[%s2414_s2 + $0x18] sm:$0xff] }
   0x3   :  { %v1295_v7 = vld [vmem:[%s2414_s2 + $0x40] sm:$0xff]  ;;  %v1300_v8 = vld [vmem:[%s2414_s2 + $0x48] sm:$0xff]  ;;  %v106_v11 = vmul.f32 %v1285_v5, %v1285_v5  ;;  %v107_v12 = vmul.f32 %v1290_v6, %v1290_v6  ;;  %v1318_v15 = vld [vmem:[%s2414_s2 + $0x30] sm:$0xff]  ;;  %v105_v21 = vmul.f32 %v1307_v10, %v1307_v10 }
   0x4   :  { %v123_v13 = vsel %vm122_vm0, %v102_v3, 0.0  ;;  %v124_v14 = vsel %vm122_vm0, %v103_v4, 0.0  ;;  %v110_v16 = vmul.f32 %v1295_v7, %v1295_v7  ;;  %v111_v17 = vmul.f32 %v1300_v8, %v1300_v8  ;;  %v1327_v18 = vld [vmem:[%s2414_s2 + $0x50] sm:$0xff]  ;;  %v1332_v19 = vld [vmem:[%s2414_s2 + $0x60] sm:$0xff]  ;;  %v1337_v20 = vld [vmem:[%s2414_s2 + $0x68] sm:$0xff] }
   0x5   :  { %2486 = vst [vmem:[#allocation5_spill] sm:$0xff] %v1327_v18  ;;  %2487 = vst [vmem:[#allocation6_spill] sm:$0xff] %v1332_v19  ;;  %v125_v22 = vadd.f32 %v124_v14, %v123_v13  ;;  %v108_v23 = vmul.f32 %v1318_v15, %v1318_v15  ;;  %v126_v24 = vsel %vm122_vm0, %v104_v9, 0.0  ;;  %v136_v25 = vsel %vm122_vm0, %v106_v11, 0.0  ;;  %v1349_v27 = vld [vmem:[%s2414_s2 + $0x38] sm:$0xff]  ;;  %v1367_v34 = vld [vmem:[%s2414_s2 + $0x70] sm:$0xff] }
   0x6   :  { %2488 = vst [vmem:[#allocation7_spill] sm:$0xff] %v1337_v20  ;;  %v137_v26 = vsel %vm122_vm0, %v107_v12, 0.0  ;;  %2489 = vst [vmem:[#allocation8_spill] sm:$0xff] %v1349_v27  ;;  %v112_v28 = vmul.f32 %v1327_v18, %v1327_v18  ;;  %v149_v29 = vsel %vm122_vm0, %v110_v16, 0.0  ;;  %v150_v30 = vsel %vm122_vm0, %v111_v17, 0.0  ;;  %v1358_v31 = vld [vmem:[%s2414_s2 + $0x58] sm:$0xff] }
   0x7   :  { %2490 = vst [vmem:[#allocation9_spill] sm:$0xff] %v1358_v31  ;;  %v114_v32 = vmul.f32 %v1332_v19, %v1332_v19  ;;  %v115_v33 = vmul.f32 %v1337_v20, %v1337_v20  ;;  %v1372_v35 = vld [vmem:[%s2416_s4] sm:$0x1f]  ;;  %v127_v36 = vadd.f32 %v126_v24, %v125_v22  ;;  %v138_v37 = vadd.f32 %v137_v26, %v136_v25  ;;  %v1386_v45 = vld [vmem:[%s2414_s2 + $0x78] sm:$0xff]  ;;  %v1400_v51 = vld [vmem:[%s2414_s2 + $0x88] sm:$0xff] }
   0x8   :  { %v109_v38 = vmul.f32 %v1349_v27, %v1349_v27  ;;  %v128_v39 = vsel %vm122_vm0, %v105_v21, 0.0  ;;  %v139_v40 = vsel %vm122_vm0, %v108_v23, 0.0  ;;  %v151_v41 = vadd.f32 %v150_v30, %v149_v29  ;;  %v1395_v50 = vld [vmem:[%s2414_s2 + $0x80] sm:$0xff]  ;;  %v1409_v60 = vld [vmem:[%s2414_s2 + $0x90] sm:$0xff]  ;;  %v1429_v24 = vld [vmem:[%s2412_s0 + $0x8] sm:$0xff] }
   0x9   :  { %v83_v42 = vsel %vm82_vm1, %v1372_v35, -inf  ;;  %v113_v43 = vmul.f32 %v1358_v31, %v1358_v31  ;;  %v152_v44 = vsel %vm122_vm0, %v112_v28, 0.0  ;;  %v116_v47 = vmul.f32 %v1367_v34, %v1367_v34  ;;  %2491 = vst [vmem:[#allocation10_spill] sm:$0xff] %v1409_v60  ;;  %v1421_v16 = vld [vmem:[%s2412_s0] sm:$0xff]  ;;  %v1434_v25 = vld [vmem:[%s2414_s2 + $0x98] sm:$0xff]  ;;  %v1439_v29 = vld [vmem:[%s2412_s0 + $0x10] sm:$0xff] }
   0xa   :  { %v84_v46 = vrot.slane %v83_v42, 4  ;;  %v162_v48 = vsel %vm122_vm0, %v114_v32, 0.0  ;;  %v163_v49 = vsel %vm122_vm0, %v115_v33, 0.0  ;;  %v129_v52 = vadd.f32 %v128_v39, %v127_v36  ;;  %2492 = vst [vmem:[#allocation11_spill] sm:$0xff] %v1421_v16  ;;  %2493 = vst [vmem:[#allocation12_spill] sm:$0xff] %v1434_v25  ;;  %v1444_v30 = vld [vmem:[%s2412_s0 + $0x18] sm:$0xff] }
   0xb   :  { %v140_v53 = vadd.f32 %v139_v40, %v138_v37  ;;  %v141_v55 = vsel %vm122_vm0, %v109_v38, 0.0  ;;  %v153_v56 = vadd.f32 %v152_v44, %v151_v41  ;;  %v117_v57 = vmul.f32 %v1386_v45, %v1386_v45  ;;  %v1449_v36 = vld [vmem:[%s2415_s3] sm:$0xff]  ;;  %v1454_v37 = vld [vmem:[%s2415_s3 + $0x8] sm:$0xff] }
   0xc   :  { %v85_v54 = vmax.f32 %v83_v42, %v84_v46  ;;  %v154_v58 = vsel %vm122_vm0, %v113_v43, 0.0  ;;  %v164_v59 = vadd.f32 %v163_v49, %v162_v48  ;;  %v118_v62 = vmul.f32 %v1395_v50, %v1395_v50  ;;  %2494 = vst [vmem:[#allocation13_spill] sm:$0xff] %v1449_v36  ;;  %2495 = vst [vmem:[#allocation14_spill] sm:$0xff] %v1454_v37  ;;  %v1461_v41 = vld [vmem:[%s2413_s1] sm:$0xff] }
   0xd   :  { %v119_v63 = vmul.f32 %v1400_v51, %v1400_v51  ;;  %v165_v3 = vsel %vm122_vm0, %v116_v47, 0.0  ;;  %v130_v4 = vrot.slane %v129_v52, 4  ;;  %v142_v9 = vadd.f32 %v141_v55, %v140_v53  ;;  %2496 = vst [vmem:[#allocation15_spill] sm:$0xff] %v1461_v41  ;;  %v1483_v53 = vld [vmem:[%s2415_s3 + $0x20] sm:$0xff] }
   0xe   :  { %v86_v61 = vrot.slane %v85_v54, 2  ;;  %v155_v12 = vadd.f32 %v154_v58, %v153_v56  ;;  %v120_v13 = vmul.f32 %v1409_v60, %v1409_v60  ;;  %v166_v14 = vadd.f32 %v165_v3, %v164_v59  ;;  %2498 = vst [vmem:[#allocation17_spill] sm:$0xff] %v1483_v53  ;;  %v1492_v58 = vld [vmem:[%s2415_s3 + $0x28] sm:$0xff] }
   0xf   :  { %v167_v21 = vsel %vm122_vm0, %v117_v57, 0.0  ;;  %v175_v22 = vsel %vm122_vm0, %v118_v62, 0.0  ;;  %v176_v23 = vsel %vm122_vm0, %v119_v63, 0.0  ;;  %v131_v26 = vadd.f32 %v130_v4, %v129_v52  ;;  %2499 = vst [vmem:[#allocation18_spill] sm:$0xff] %v1492_v58  ;;  %v1505_v3 = vld [vmem:[%s2413_s1 + $0x8] sm:$0xff]  ;;  %v1510_v4 = vld [vmem:[%s2413_s1 + $0x10] sm:$0xff] }
  0x10   :  { %v87_v11 = vmax.f32 %v85_v54, %v86_v61  ;;  %v143_v28 = vrot.slane %v142_v9, 4  ;;  %v156_v33 = vrot.slane %v155_v12, 4  ;;  %v168_v38 = vadd.f32 %v167_v21, %v166_v14  ;;  %2500 = vst [vmem:[#allocation19_spill] sm:$0xff] %v1505_v3  ;;  %2501 = vst [vmem:[#allocation20_spill] sm:$0xff] %v1510_v4  ;;  %v1523_v14 = vld [vmem:[%s2415_s3 + $0x40] sm:$0xff] }
  0x11   :  { %v177_v39 = vadd.f32 %v176_v23, %v175_v22  ;;  %v273_v40 = vmul.f32 %v1421_v16, %v1421_v16  ;;  %v121_v43 = vmul.f32 %v1434_v25, %v1434_v25  ;;  %v178_v44 = vsel %vm122_vm0, %v120_v13, 0.0  ;;  %v1518_v13 = vld [vmem:[%s2415_s3 + $0x18] sm:$0xff]  ;;  %2503 = vst [vmem:[#allocation22_spill] sm:$0xff] %v1523_v14 }
  0x12   :  { %v88_v17 = vrot.slane %v87_v11, 1  ;;  %v274_v46 = vmul.f32 %v1429_v24, %v1429_v24  ;;  %v132_v47 = vrot.slane %v131_v26, 2  ;;  %v144_v48 = vadd.f32 %v143_v28, %v142_v9  ;;  %2502 = vst [vmem:[#allocation21_spill] sm:$0xff] %v1518_v13 }
  0x13   :  { %v275_v49 = vmul.f32 %v1439_v29, %v1439_v29  ;;  %v1473_v52 = vmul.f32 %v1444_v30, %v1444_v30  ;;  %v157_v55 = vadd.f32 %v156_v33, %v155_v12  ;;  %v188_v56 = vmul.f32 %v1449_v36, %v1449_v36 }
  0x14   :  { %v89_v32 = vmax.f32 %v87_v11, %v88_v17  ;;  %v189_v57 = vmul.f32 %v1454_v37, %v1454_v37  ;;  %v169_v59 = vrot.slane %v168_v38, 4  ;;  %v179_v61 = vadd.f32 %v178_v44, %v177_v39  ;;  %v1528_v17 = vld [vmem:[%s2415_s3 + $0x48] sm:$0xff] }
  0x15   :  { %v1496_v62 = vmul.f32 %v1461_v41, %v1461_v41  ;;  %v1500_v63 = vmul.f32 %v1461_v41, %v1421_v16  ;;  %v180_v9 = vsel %vm122_vm0, %v121_v43, 0.0  ;;  %v277_v11 = vsel %vm122_vm0, %v273_v40, 0.0  ;;  %2504 = vst [vmem:[#allocation23_spill] sm:$0xff] %v1528_v17 }
  0x16   :  { %v90_v42 = vsub.f32 %v1372_v35, %v89_v32  ;;  %v1478_v35 = vld [vmem:[%s2415_s3 + $0x10] sm:$0xff]  ;;  %v278_v12 = vsel %vm122_vm0, %v274_v46, 0.0  ;;  %v133_v21 = vadd.f32 %v132_v47, %v131_v26  ;;  %v145_v22 = vrot.slane %v144_v48, 2 }
  0x17   :  { %2497 = vst [vmem:[#allocation16_spill] sm:$0xff] %v1478_v35  ;;  %v190_v23 = vmul.f32 %v1478_v35, %v1478_v35  ;;  %v192_v28 = vmul.f32 %v1483_v53, %v1483_v53  ;;  %v1537_v32 = vld [vmem:[%s2415_s3 + $0x30] sm:$0xff]  ;;  %v158_v33 = vrot.slane %v157_v55, 2  ;;  %v193_v39 = vmul.f32 %v1492_v58, %v1492_v58 }
  0x18   :  { %v91_v54 = vmul.f32 1.442695, %v90_v42  ;;  %2505 = vst [vmem:[#allocation24_spill] sm:$0xff] %v1537_v32  ;;  %v208_v40 = vsel %vm122_vm0, %v188_v56, 0.0  ;;  %v209_v26 = vsel %vm122_vm0, %v189_v57, 0.0  ;;  %v170_v42 = vadd.f32 %v169_v59, %v168_v38  ;;  %v1554_v47 = vld [vmem:[%s2415_s3 + $0x50] sm:$0xff] }
  0x19   :  { %v181_v43 = vadd.f32 %v180_v9, %v179_v61  ;;  %v1545_v44 = vmul.f32 %v1505_v3, %v1505_v3  ;;  %v1549_v46 = vmul.f32 %v1510_v4, %v1510_v4  ;;  %2506 = vst [vmem:[#allocation25_spill] sm:$0xff] %v1554_v47  ;;  %v196_v38 = vmul.f32 %v1523_v14, %v1523_v14  ;;  %v1567_v59 = vld [vmem:[%s2415_s3 + $0x60] sm:$0xff]  ;;  %v1572_v61 = vld [vmem:[%s2415_s3 + $0x68] sm:$0xff] }
  0x1a   :  { %1161 = vpow2.f32 %v91_v54  ;;  %v191_v54 = vmul.f32 %v1518_v13, %v1518_v13  ;;  %v197_v56 = vmul.f32 %v1528_v17, %v1528_v17  ;;  %v1562_v57 = vadd.f32 %v278_v12, %v277_v11  ;;  %2507 = vst [vmem:[#allocation26_spill] sm:$0xff] %v1567_v59  ;;  %2508 = vst [vmem:[#allocation27_spill] sm:$0xff] %v1572_v61  ;;  %v1579_v11 = vld [vmem:[%s2415_s3 + $0x38] sm:$0xff] }
  0x1b   :  { %v134_v9 = vrot.slane %v133_v21, 1  ;;  %v146_v13 = vadd.f32 %v145_v22, %v144_v48  ;;  %v194_v14 = vmul.f32 %v1537_v32, %v1537_v32  ;;  %v210_v35 = vadd.f32 %v209_v26, %v208_v40  ;;  %2509 = vst [vmem:[#allocation28_spill] sm:$0xff] %v1579_v11  ;;  %v1592_v40 = vld [vmem:[%s2415_s3 + $0x58] sm:$0xff] }
  0x1c   :  { %v159_v12 = vadd.f32 %v158_v33, %v157_v55  ;;  %v211_v17 = vsel %vm122_vm0, %v190_v23, 0.0  ;;  %v221_v58 = vsel %vm122_vm0, %v192_v28, 0.0  ;;  %v222_v53 = vsel %vm122_vm0, %v193_v39, 0.0  ;;  %2510 = vst [vmem:[#allocation29_spill] sm:$0xff] %v1592_v40 }
  0x1d   :  { %v171_v37 = vrot.slane %v170_v42, 2  ;;  %v182_v36 = vrot.slane %v181_v43, 4  ;;  %v198_v48 = vmul.f32 %v1554_v47, %v1554_v47  ;;  %v1587_v22 = vsel %vm122_vm0, %v275_v49, 0.0  ;;  %v1603_v49 = vld [vmem:[%s2415_s3 + $0x70] sm:$0xff] }
  0x1e   :  { %v200_v55 = vmul.f32 %v1567_v59, %v1567_v59  ;;  %v201_v23 = vmul.f32 %v1572_v61, %v1572_v61  ;;  %v234_v28 = vsel %vm122_vm0, %v196_v38, 0.0  ;;  %v235_v33 = vsel %vm122_vm0, %v197_v56, 0.0  ;;  %2511 = vst [vmem:[#allocation30_spill] sm:$0xff] %v1603_v49  ;;  %v1612_v61 = vld [vmem:[%s2415_s3 + $0x80] sm:$0xff]  ;;  %v1617_v38 = vld [vmem:[%s2415_s3 + $0x88] sm:$0xff] }
  0x1f   :  { %v1605_v39 = vadd.f32 %v134_v9, %v133_v21  ;;  %v195_v26 = vmul.f32 %v1579_v11, %v1579_v11  ;;  %v212_v47 = vadd.f32 %v211_v17, %v210_v35  ;;  %v223_v32 = vadd.f32 %v222_v53, %v221_v58  ;;  %2513 = vst [vmem:[#allocation32_spill] sm:$0xff] %v1612_v61  ;;  %v1624_v35 = vld [vmem:[%s2415_s3 + $0x78] sm:$0xff] }
  0x20   :  { %2514 = vst [vmem:[#allocation33_spill] sm:$0xff] %v1617_v38  ;;  %v147_v56 = vrot.slane %v146_v13, 1  ;;  %v160_v59 = vrot.slane %v159_v12, 1  ;;  %v213_v21 = vsel %vm122_vm0, %v191_v54, 0.0  ;;  %v224_v9 = vsel %vm122_vm0, %v194_v14, 0.0  ;;  %2515 = vst [vmem:[#allocation34_spill] sm:$0xff] %v1624_v35 }
  0x21   :  { %2512 = vst [vmem:[#allocation31_spill] sm:$0xff] %v1605_v39  ;;  %v1626_v53 = vadd.f32 %v171_v37, %v170_v42  ;;  %v183_v58 = vadd.f32 %v182_v36, %v181_v43  ;;  %v199_v17 = vmul.f32 %v1592_v40, %v1592_v40  ;;  %v236_v39 = vadd.f32 %v235_v33, %v234_v28  ;;  %v1640_v37 = vld [vmem:[%s2415_s3 + $0x90] sm:$0xff] }
  0x22   :  { %v202_v11 = vmul.f32 %v1603_v49, %v1603_v49  ;;  %v237_v16 = vsel %vm122_vm0, %v198_v48, 0.0  ;;  %v247_v54 = vsel %vm122_vm0, %v200_v55, 0.0  ;;  %v248_v14 = vsel %vm122_vm0, %v201_v23, 0.0  ;;  %2516 = vst [vmem:[#allocation35_spill] sm:$0xff] %v1640_v37 }
  0x23   :  { %v204_v36 = vmul.f32 %v1612_v61, %v1612_v61  ;;  %v205_v42 = vmul.f32 %v1617_v38, %v1617_v38  ;;  %v214_v43 = vadd.f32 %v213_v21, %v212_v47  ;;  %v225_v28 = vadd.f32 %v224_v9, %v223_v32  ;;  %v1659_v32 = vld [vmem:[%s2415_s3 + $0x98] sm:$0xff] }
  0x24   :  { %v1646_v48 = vadd.f32 %v147_v56, %v146_v13  ;;  %v1648_v55 = vadd.f32 %v160_v59, %v159_v12  ;;  %v203_v23 = vmul.f32 %v1624_v35, %v1624_v35  ;;  %v226_v33 = vsel %vm122_vm0, %v195_v26, 0.0  ;;  %2519 = vst [vmem:[#allocation38_spill] sm:$0xff] %v1659_v32 }
  0x25   :  { %v238_v61 = vadd.f32 %v237_v16, %v236_v39  ;;  %v249_v60 = vadd.f32 %v248_v14, %v247_v54  ;;  %v206_v13 = vmul.f32 %v1640_v37, %v1640_v37  ;;  %v239_v47 = vsel %vm122_vm0, %v199_v17, 0.0 }
  0x26   :  { %2517 = vst [vmem:[#allocation36_spill] sm:$0xff] %v1646_v48  ;;  %2518 = vst [vmem:[#allocation37_spill] sm:$0xff] %v1648_v55  ;;  %v250_v59 = vsel %vm122_vm0, %v202_v11, 0.0  ;;  %v308_v12 = vmul.f32 %v1505_v3, %v1429_v24  ;;  %v215_v26 = vrot.slane %v214_v43, 4  ;;  %v227_v56 = vadd.f32 %v226_v33, %v225_v28  ;;  %v1676_v11 = vld [vmem:[%s2413_s1 + $0x18] sm:$0xff] }
  0x27   :  { %v1635_v25 = vpop.eup %1161  ;;  %v260_v16 = vsel %vm122_vm0, %v204_v36, 0.0  ;;  %v261_v39 = vsel %vm122_vm0, %v205_v42, 0.0  ;;  %v184_v9 = vrot.slane %v183_v58, 2  ;;  %v294_v54 = vsel %vm122_vm0, %v1496_v62, 0.0 }
  0x28   :  { %v93_v40 = vsel %vm82_vm1, %v1635_v25, 0.0  ;;  %v295_v14 = vsel %vm122_vm0, %v1545_v44, 0.0  ;;  %v207_v17 = vmul.f32 %v1659_v32, %v1659_v32  ;;  %v240_v28 = vadd.f32 %v239_v47, %v238_v61 }
  0x29   :  { %v94_v21 = vrot.slane %v93_v40, 4  ;;  %v251_v36 = vadd.f32 %v250_v59, %v249_v60  ;;  %v252_v42 = vsel %vm122_vm0, %v203_v23, 0.0  ;;  %v262_v33 = vadd.f32 %v261_v39, %v260_v16 }
  0x2a   :  { %v309_v49 = vmul.f32 %v1510_v4, %v1439_v29  ;;  %v311_v62 = vsel %vm122_vm0, %v1500_v63, 0.0  ;;  %v312_v44 = vsel %vm122_vm0, %v308_v12, 0.0  ;;  %v1686_v55 = vadd.f32 %v215_v26, %v214_v43 }
  0x2b   :  { %v228_v48 = vrot.slane %v227_v56, 4  ;;  %v263_v37 = vsel %vm122_vm0, %v206_v13, 0.0  ;;  %v296_v35 = vadd.f32 %v295_v14, %v294_v54  ;;  %v95_v32 = vadd.f32 %v94_v21, %v93_v40 }
  0x2c   :  { %v1689_v61 = vadd.f32 %v184_v9, %v183_v58  ;;  %v293_v60 = vmul.f32 %v1676_v11, %v1676_v11  ;;  %v297_v23 = vsel %vm122_vm0, %v1549_v46, 0.0  ;;  %v241_v47 = vrot.slane %v240_v28, 4 }
  0x2d   :  { %v281_v63 = vadd.f32 %v1587_v22, %v1562_v57  ;;  %v282_v43 = vsel %vm122_vm0, %v1473_v52, 0.0  ;;  %v313_v59 = vadd.f32 %v312_v44, %v311_v62  ;;  %v253_v12 = vadd.f32 %v252_v42, %v251_v36 }
  0x2e   :  { %v264_v13 = vadd.f32 %v263_v37, %v262_v33  ;;  %v310_v40 = vmul.f32 %v1676_v11, %v1444_v30  ;;  %v314_v58 = vsel %vm122_vm0, %v309_v49, 0.0  ;;  %v1703_v16 = vadd.f32 %v228_v48, %v227_v56 }
  0x2f   :  { %v265_v46 = vsel %vm122_vm0, %v207_v17, 0.0  ;;  %v298_v39 = vadd.f32 %v297_v23, %v296_v35  ;;  %v96_v21 = vrot.slane %v95_v32, 2  ;;  %v299_v57 = vsel %vm122_vm0, %v293_v60, 0.0 }
  0x30   :  { %v324_v52 = vmul.f32 %v1266_v0, %v1461_v41  ;;  %v325_v22 = vmul.f32 %v1271_v1, %v1505_v3  ;;  %v283_v37 = vadd.f32 %v282_v43, %v281_v63  ;;  %v315_v9 = vadd.f32 %v314_v58, %v313_v59 }
  0x31   :  { %v328_v49 = vmul.f32 %v1285_v5, %v1461_v41  ;;  %v329_v48 = vmul.f32 %v1290_v6, %v1505_v3  ;;  %v1715_v56 = vadd.f32 %v241_v47, %v240_v28  ;;  %v254_v35 = vrot.slane %v253_v12, 4 }
  0x32   :  { %v266_v54 = vadd.f32 %v265_v46, %v264_v13  ;;  %v316_v14 = vsel %vm122_vm0, %v310_v40, 0.0  ;;  %v300_v17 = vadd.f32 %v299_v57, %v298_v39  ;;  %v326_v36 = vmul.f32 %v1276_v2, %v1510_v4 }
  0x33   :  { %v332_v42 = vmul.f32 %v1295_v7, %v1461_v41  ;;  %v333_v33 = vmul.f32 %v1300_v8, %v1505_v3  ;;  %v97_v62 = vadd.f32 %v96_v21, %v95_v32  ;;  %v330_v44 = vmul.f32 %v1318_v15, %v1510_v4 }
  0x34   :  { %v344_v28 = vsel %vm122_vm0, %v324_v52, 0.0  ;;  %v345_v60 = vsel %vm122_vm0, %v325_v22, 0.0  ;;  %v317_v23 = vadd.f32 %v316_v14, %v315_v9  ;;  %v327_v47 = vmul.f32 %v1307_v10, %v1676_v11 }
  0x35   :  { %v357_v63 = vsel %vm122_vm0, %v328_v49, 0.0  ;;  %v358_v43 = vsel %vm122_vm0, %v329_v48, 0.0  ;;  %v334_v59 = vmul.f32 %v1327_v18, %v1510_v4  ;;  %v336_v32 = vmul.f32 %v1332_v19, %v1461_v41 }
  0x36   :  { %v337_v13 = vmul.f32 %v1337_v20, %v1505_v3  ;;  %v346_v40 = vadd.f32 %v345_v60, %v344_v28  ;;  %v347_v58 = vsel %vm122_vm0, %v326_v36, 0.0  ;;  %v359_v46 = vadd.f32 %v358_v43, %v357_v63 }
  0x37   :  { %v370_v39 = vsel %vm122_vm0, %v332_v42, 0.0  ;;  %v371_v21 = vsel %vm122_vm0, %v333_v33, 0.0  ;;  %v267_v57 = vrot.slane %v266_v54, 4  ;;  %v284_v52 = vrot.slane %v283_v37, 4 }
  0x38   :  { %v331_v22 = vmul.f32 %v1349_v27, %v1676_v11  ;;  %v360_v9 = vsel %vm122_vm0, %v330_v44, 0.0  ;;  %v98_v49 = vrot.slane %v97_v62, 1  ;;  %v301_v48 = vrot.slane %v300_v17, 4 }
  0x39   :  { %v318_v14 = vrot.slane %v317_v23, 4  ;;  %v335_v28 = vmul.f32 %v1358_v31, %v1676_v11  ;;  %v338_v36 = vmul.f32 %v1367_v34, %v1510_v4  ;;  %v348_v60 = vadd.f32 %v347_v58, %v346_v40 }
  0x3a   :  { %v349_v42 = vsel %vm122_vm0, %v327_v47, 0.0  ;;  %v372_v33 = vadd.f32 %v371_v21, %v370_v39  ;;  %v361_v63 = vadd.f32 %v360_v9, %v359_v46  ;;  %v373_v43 = vsel %vm122_vm0, %v334_v59, 0.0 }
  0x3b   :  { %v383_v26 = vsel %vm122_vm0, %v336_v32, 0.0  ;;  %v384_v44 = vsel %vm122_vm0, %v337_v13, 0.0  ;;  %v255_v38 = vadd.f32 %v254_v35, %v253_v12  ;;  %v268_v20 = vadd.f32 %v267_v57, %v266_v54  ;;  %v2520_v57 = vld [vmem:[#allocation10_spill] sm:$0xff] }
  0x3c   :  { %v285_v19 = vadd.f32 %v284_v52, %v283_v37  ;;  %v362_v18 = vsel %vm122_vm0, %v331_v22, 0.0  ;;  %v99_v31 = vadd.f32 %v98_v49, %v97_v62  ;;  %v302_v27 = vadd.f32 %v301_v48, %v300_v17 }
  0x3d   :  { %v339_v40 = vmul.f32 %v1386_v45, %v1676_v11  ;;  %v340_v47 = vmul.f32 %v1395_v50, %v1461_v41  ;;  %v319_v58 = vadd.f32 %v318_v14, %v317_v23  ;;  %v350_v46 = vadd.f32 %v349_v42, %v348_v60 }
  0x3e   :  { %v374_v59 = vadd.f32 %v373_v43, %v372_v33  ;;  %v385_v39 = vadd.f32 %v384_v44, %v383_v26  ;;  %v341_v32 = vmul.f32 %v1400_v51, %v1505_v3  ;;  %v363_v12 = vadd.f32 %v362_v18, %v361_v63 }
  0x3f   :  { %v375_v37 = vsel %vm122_vm0, %v335_v28, 0.0  ;;  %v386_v35 = vsel %vm122_vm0, %v338_v36, 0.0  ;;  %v230_v54 = vrot.slane %v1703_v16, 2  ;;  %v243_v17 = vrot.slane %v1715_v56, 2 }
  0x40   :  { %v256_v62 = vrot.slane %v255_v38, 2  ;;  %v286_v13 = vrot.slane %v285_v19, 2  ;;  %1163 = vrcp.f32 %v99_v31  ;;  %v269_v21 = vrot.slane %v268_v20, 2 }
  0x41   :  { %v303_v23 = vrot.slane %v302_v27, 2  ;;  %v342_v26 = vmul.f32 %v2520_v57, %v1510_v4  ;;  %v320_v52 = vrot.slane %v319_v58, 2  ;;  %v351_v22 = vrot.slane %v350_v46, 4 }
  0x42   :  { %v376_v9 = vadd.f32 %v375_v37, %v374_v59  ;;  %v387_v18 = vadd.f32 %v386_v35, %v385_v39  ;;  %v364_v49 = vrot.slane %v363_v12, 4  ;;  %v388_v48 = vsel %vm122_vm0, %v339_v40, 0.0 }
  0x43   :  { %v396_v14 = vsel %vm122_vm0, %v340_v47, 0.0  ;;  %v397_v28 = vsel %vm122_vm0, %v341_v32, 0.0  ;;  %v186_v36 = vrot.slane %v1689_v61, 1  ;;  %v2521_v31 = vrot.slane %v1686_v55, 2  ;;  %v2522_v32 = vld [vmem:[#allocation12_spill] sm:$0xff] }
  0x44   :  { %v231_v42 = vadd.f32 %v230_v54, %v1703_v16  ;;  %v244_v33 = vadd.f32 %v243_v17, %v1715_v56  ;;  %v257_v63 = vadd.f32 %v256_v62, %v255_v38  ;;  %v270_v43 = vadd.f32 %v269_v21, %v268_v20 }
  0x45   :  { %v218_v60 = vadd.f32 %v2521_v31, %v1686_v55  ;;  %v287_v44 = vadd.f32 %v286_v13, %v285_v19  ;;  %v304_v59 = vadd.f32 %v303_v23, %v302_v27  ;;  %v352_v39 = vadd.f32 %v351_v22, %v350_v46 }
  0x46   :  { %v377_v40 = vrot.slane %v376_v9, 4  ;;  %v389_v37 = vadd.f32 %v388_v48, %v387_v18  ;;  %v398_v47 = vadd.f32 %v397_v28, %v396_v14  ;;  %v321_v35 = vadd.f32 %v320_v52, %v319_v58 }
  0x47   :  { %v343_v4 = vmul.f32 %v2522_v32, %v1676_v11  ;;  %v365_v3 = vadd.f32 %v364_v49, %v363_v12  ;;  %v399_v41 = vsel %vm122_vm0, %v342_v26, 0.0  ;;  %v2523_v55 = vrot.slane %v1626_v53, 1 }
  0x48   :  { %v1783_v20 = vadd.f32 %v186_v36, %v1689_v61  ;;  %v219_v19 = vrot.slane %v218_v60, 1  ;;  %v232_v27 = vrot.slane %v231_v42, 1  ;;  %v245_v38 = vrot.slane %v244_v33, 1  ;;  %v2528_v61 = vld [vmem:[#allocation11_spill] sm:$0xff] }
  0x49   :  { %v1780_v16 = vadd.f32 %v2523_v55, %v1626_v53  ;;  %v258_v56 = vrot.slane %v257_v63, 1  ;;  %v271_v46 = vrot.slane %v270_v43, 1  ;;  %v288_v58 = vrot.slane %v287_v44, 1 }
  0x4a   :  { %2525 = vst [vmem:[#allocation12_spill] sm:$0xff] %v1783_v20  ;;  %v353_v54 = vrot.slane %v352_v39, 2  ;;  %v378_v17 = vadd.f32 %v377_v40, %v376_v9  ;;  %v390_v62 = vrot.slane %v389_v37, 4  ;;  %v400_v12 = vadd.f32 %v399_v41, %v398_v47 }
  0x4b   :  { %2524 = vst [vmem:[#allocation10_spill] sm:$0xff] %v1780_v16  ;;  %v305_v13 = vrot.slane %v304_v59, 1  ;;  %v322_v21 = vrot.slane %v321_v35, 1  ;;  %v366_v23 = vrot.slane %v365_v3, 2  ;;  %v401_v26 = vsel %vm122_vm0, %v343_v4, 0.0 }
  0x4c   :  { %v1786_v53 = vadd.f32 %v219_v19, %v218_v60  ;;  %v1788_v52 = vadd.f32 %v232_v27, %v231_v42  ;;  %v409_v22 = vmul.f32 %v1266_v0, %v2528_v61  ;;  %v410_v18 = vmul.f32 %v1271_v1, %v1429_v24 }
  0x4d   :  { %v1794_v49 = vadd.f32 %v245_v38, %v244_v33  ;;  %v1796_v9 = vadd.f32 %v258_v56, %v257_v63  ;;  %v1798_v41 = vadd.f32 %v271_v46, %v270_v43  ;;  %v1800_v48 = vadd.f32 %v288_v58, %v287_v44  ;;  %v1164_v14 = vpop.eup %1163  ;;  %v2535_v56 = vld [vmem:[#allocation6_spill] sm:$0xff]  ;;  %v2536_v58 = vld [vmem:[#allocation7_spill] sm:$0xff] }
  0x4e   :  { %2526 = vst [vmem:[#allocation39_spill] sm:$0xff] %v1786_v53  ;;  %2527 = vst [vmem:[#allocation40_spill] sm:$0xff] %v1788_v52  ;;  %v354_v4 = vadd.f32 %v353_v54, %v352_v39  ;;  %v379_v28 = vrot.slane %v378_v17, 2  ;;  %v391_v36 = vadd.f32 %v390_v62, %v389_v37  ;;  %v402_v31 = vadd.f32 %v401_v26, %v400_v12 }
  0x4f   :  { %2529 = vst [vmem:[#allocation11_spill] sm:$0xff] %v1794_v49  ;;  %2530 = vst [vmem:[#allocation41_spill] sm:$0xff] %v1796_v9  ;;  %v1802_v60 = vadd.f32 %v305_v13, %v304_v59  ;;  %v1804_v42 = vadd.f32 %v322_v21, %v321_v35  ;;  %v367_v0 = vadd.f32 %v366_v23, %v365_v3  ;;  %v429_v43 = vsel %vm122_vm0, %v409_v22, 0.0  ;;  %v2537_v23 = vld [vmem:[#allocation9_spill] sm:$0xff] }
  0x50   :  { %2531 = vst [vmem:[#allocation42_spill] sm:$0xff] %v1798_v41  ;;  %v411_v1 = vmul.f32 %v1276_v2, %v1439_v29  ;;  %v413_v33 = vmul.f32 %v1285_v5, %v2528_v61  ;;  %v414_v63 = vmul.f32 %v1290_v6, %v1429_v24  ;;  %v430_v44 = vsel %vm122_vm0, %v410_v18, 0.0 }
  0x51   :  { %v1815_v39 = vmul.f32 %v1164_v14, %v1635_v25  ;;  %v412_v59 = vmul.f32 %v1307_v10, %v1444_v30  ;;  %v417_v3 = vmul.f32 %v1295_v7, %v2528_v61  ;;  %v418_v2 = vmul.f32 %v1300_v8, %v1429_v24  ;;  %v2533_v25 = vld [vmem:[#allocation8_spill] sm:$0xff]  ;;  %v2534_v10 = vld [vmem:[#allocation5_spill] sm:$0xff] }
  0x52   :  { %v355_v5 = vrot.slane %v354_v4, 1  ;;  %v380_v40 = vadd.f32 %v379_v28, %v378_v17  ;;  %v392_v37 = vrot.slane %v391_v36, 2  ;;  %v403_v6 = vrot.slane %v402_v31, 4 }
  0x53   :  { %2532 = vst [vmem:[#allocation43_spill] sm:$0xff] %v1815_v39  ;;  %v368_v47 = vrot.slane %v367_v0, 1  ;;  %v415_v35 = vmul.f32 %v1318_v15, %v1439_v29  ;;  %v416_v55 = vmul.f32 %v2533_v25, %v1444_v30  ;;  %v431_v19 = vadd.f32 %v430_v44, %v429_v43 }
  0x54   :  { %v419_v27 = vmul.f32 %v2534_v10, %v1439_v29  ;;  %v432_v7 = vsel %vm122_vm0, %v411_v1, 0.0  ;;  %v442_v38 = vsel %vm122_vm0, %v413_v33, 0.0  ;;  %v443_v8 = vsel %vm122_vm0, %v414_v63, 0.0  ;;  %v2541_v10 = vld [vmem:[#allocation14_spill] sm:$0xff] }
  0x55   :  { %v421_v46 = vmul.f32 %v2535_v56, %v2528_v61  ;;  %v422_v54 = vmul.f32 %v2536_v58, %v1429_v24  ;;  %v455_v15 = vsel %vm122_vm0, %v417_v3, 0.0  ;;  %v456_v17 = vsel %vm122_vm0, %v418_v2, 0.0 }
  0x56   :  { %v1838_v62 = vadd.f32 %v355_v5, %v354_v4  ;;  %v381_v12 = vrot.slane %v380_v40, 1  ;;  %v1840_v13 = vadd.f32 %v392_v37, %v391_v36  ;;  %v1842_v21 = vadd.f32 %v403_v6, %v402_v31 }
  0x57   :  { %v420_v26 = vmul.f32 %v2537_v23, %v1444_v30  ;;  %v423_v22 = vmul.f32 %v1367_v34, %v1439_v29  ;;  %v433_v18 = vadd.f32 %v432_v7, %v431_v19  ;;  %v444_v14 = vadd.f32 %v443_v8, %v442_v38  ;;  %v2540_v19 = vld [vmem:[#allocation13_spill] sm:$0xff]  ;;  %v2545_v23 = vld [vmem:[#allocation24_spill] sm:$0xff] }
  0x58   :  { %v424_v28 = vmul.f32 %v1386_v45, %v1444_v30  ;;  %v434_v1 = vsel %vm122_vm0, %v412_v59, 0.0  ;;  %v445_v4 = vsel %vm122_vm0, %v415_v35, 0.0  ;;  %v457_v33 = vadd.f32 %v456_v17, %v455_v15  ;;  %v2544_v17 = vld [vmem:[#allocation16_spill] sm:$0xff] }
  0x59   :  { %v425_v36 = vmul.f32 %v1395_v50, %v2528_v61  ;;  %v458_v31 = vsel %vm122_vm0, %v419_v27, 0.0  ;;  %v468_v63 = vsel %vm122_vm0, %v421_v46, 0.0  ;;  %v469_v43 = vsel %vm122_vm0, %v422_v54, 0.0 }
  0x5a   :  { %v1857_v34 = vadd.f32 %v368_v47, %v367_v0  ;;  %v1859_v44 = vadd.f32 %v381_v12, %v380_v40  ;;  %v426_v3 = vmul.f32 %v1400_v51, %v1429_v24  ;;  %v427_v50 = vmul.f32 %v2520_v57, %v1439_v29 }
  0x5b   :  { %v435_v2 = vadd.f32 %v434_v1, %v433_v18  ;;  %v446_v5 = vadd.f32 %v445_v4, %v444_v14  ;;  %v428_v37 = vmul.f32 %v2522_v32, %v1444_v30  ;;  %v447_v0 = vsel %vm122_vm0, %v416_v55, 0.0  ;;  %v2542_v32 = vld [vmem:[#allocation17_spill] sm:$0xff]  ;;  %v2543_v55 = vld [vmem:[#allocation18_spill] sm:$0xff]  ;;  %v2547_v14 = vld [vmem:[#allocation23_spill] sm:$0xff] }
  0x5c   :  { %2538 = vst [vmem:[#allocation8_spill] sm:$0xff] %v1857_v34  ;;  %2539 = vst [vmem:[#allocation5_spill] sm:$0xff] %v1859_v44  ;;  %v459_v6 = vadd.f32 %v458_v31, %v457_v33  ;;  %v470_v40 = vadd.f32 %v469_v43, %v468_v63  ;;  %v460_v47 = vsel %vm122_vm0, %v420_v26, 0.0  ;;  %v471_v35 = vsel %vm122_vm0, %v423_v22, 0.0  ;;  %v2546_v22 = vld [vmem:[#allocation22_spill] sm:$0xff]  ;;  %v2549_v33 = vld [vmem:[#allocation27_spill] sm:$0xff] }
  0x5d   :  { %v473_v25 = vsel %vm122_vm0, %v424_v28, 0.0  ;;  %v481_v51 = vsel %vm122_vm0, %v425_v36, 0.0  ;;  %v494_v57 = vmul.f32 %v2540_v19, %v2528_v61  ;;  %v495_v27 = vmul.f32 %v2541_v10, %v1429_v24  ;;  %v2548_v1 = vld [vmem:[#allocation26_spill] sm:$0xff] }
  0x5e   :  { %v498_v7 = vmul.f32 %v2542_v32, %v2528_v61  ;;  %v499_v38 = vmul.f32 %v2543_v55, %v1429_v24  ;;  %v436_v8 = vrot.slane %v435_v2, 4  ;;  %v1882_v56 = vadd.f32 %v447_v0, %v446_v5  ;;  %v2550_v0 = vld [vmem:[#allocation21_spill] sm:$0xff] }
  0x5f   :  { %v482_v46 = vsel %vm122_vm0, %v426_v3, 0.0  ;;  %v484_v58 = vsel %vm122_vm0, %v427_v50, 0.0  ;;  %v461_v54 = vadd.f32 %v460_v47, %v459_v6  ;;  %v472_v15 = vadd.f32 %v471_v35, %v470_v40  ;;  %v2551_v40 = vld [vmem:[#allocation28_spill] sm:$0xff]  ;;  %v2552_v35 = vld [vmem:[#allocation25_spill] sm:$0xff] }
  0x60   :  { %v496_v12 = vmul.f32 %v2544_v17, %v1439_v29  ;;  %v500_v26 = vmul.f32 %v2545_v23, %v1439_v29  ;;  %v502_v18 = vmul.f32 %v2546_v22, %v2528_v61  ;;  %v503_v28 = vmul.f32 %v2547_v14, %v1429_v24 }
  0x61   :  { %v506_v4 = vmul.f32 %v2548_v1, %v2528_v61  ;;  %v507_v36 = vmul.f32 %v2549_v33, %v1429_v24  ;;  %v514_v31 = vsel %vm122_vm0, %v494_v57, 0.0  ;;  %v515_v63 = vsel %vm122_vm0, %v495_v27, 0.0  ;;  %v2553_v57 = vld [vmem:[#allocation30_spill] sm:$0xff]  ;;  %v2554_v27 = vld [vmem:[#allocation32_spill] sm:$0xff] }
  0x62   :  { %v527_v43 = vsel %vm122_vm0, %v498_v7, 0.0  ;;  %v528_v3 = vsel %vm122_vm0, %v499_v38, 0.0  ;;  %v483_v50 = vadd.f32 %v482_v46, %v481_v51  ;;  %v486_v5 = vsel %vm122_vm0, %v428_v37, 0.0  ;;  %v2555_v38 = vld [vmem:[#allocation33_spill] sm:$0xff] }
  0x63   :  { %v497_v6 = vmul.f32 %v2550_v0, %v1444_v30  ;;  %v501_v47 = vmul.f32 %v2551_v40, %v1444_v30  ;;  %v504_v45 = vmul.f32 %v2552_v35, %v1439_v29  ;;  %v508_v59 = vmul.f32 %v2553_v57, %v1439_v29 }
  0x64   :  { %v510_v7 = vmul.f32 %v2554_v27, %v2528_v61  ;;  %v511_v51 = vmul.f32 %v2555_v38, %v1429_v24  ;;  %v516_v46 = vadd.f32 %v515_v63, %v514_v31  ;;  %v517_v37 = vsel %vm122_vm0, %v496_v12, 0.0  ;;  %v2556_v24 = vld [vmem:[#allocation29_spill] sm:$0xff]  ;;  %v2557_v12 = vld [vmem:[#allocation34_spill] sm:$0xff] }
  0x65   :  { %v529_v39 = vadd.f32 %v528_v3, %v527_v43  ;;  %v530_v41 = vsel %vm122_vm0, %v500_v26, 0.0  ;;  %v540_v9 = vsel %vm122_vm0, %v502_v18, 0.0  ;;  %v541_v49 = vsel %vm122_vm0, %v503_v28, 0.0  ;;  %v2558_v26 = vld [vmem:[#allocation35_spill] sm:$0xff] }
  0x66   :  { %v553_v52 = vsel %vm122_vm0, %v506_v4, 0.0  ;;  %v554_v53 = vsel %vm122_vm0, %v507_v36, 0.0  ;;  %v1921_v44 = vadd.f32 %v436_v8, %v435_v2  ;;  %v474_v61 = vadd.f32 %v473_v25, %v472_v15 }
  0x67   :  { %v485_v20 = vadd.f32 %v484_v58, %v483_v50  ;;  %v505_v31 = vmul.f32 %v2556_v24, %v1444_v30  ;;  %v509_v63 = vmul.f32 %v2557_v12, %v1444_v30  ;;  %v512_v43 = vmul.f32 %v2558_v26, %v1439_v29 }
  0x68   :  { %v566_v18 = vsel %vm122_vm0, %v510_v7, 0.0  ;;  %v567_v28 = vsel %vm122_vm0, %v511_v51, 0.0  ;;  %v518_v4 = vadd.f32 %v517_v37, %v516_v46  ;;  %v531_v3 = vadd.f32 %v530_v41, %v529_v39 }
  0x69   :  { %v542_v36 = vadd.f32 %v541_v49, %v540_v9  ;;  %v555_v2 = vadd.f32 %v554_v53, %v553_v52  ;;  %v519_v25 = vsel %vm122_vm0, %v497_v6, 0.0  ;;  %v532_v8 = vsel %vm122_vm0, %v501_v47, 0.0  ;;  %v2560_v53 = vld [vmem:[#allocation38_spill] sm:$0xff] }
  0x6a   :  { %v543_v58 = vsel %vm122_vm0, %v504_v45, 0.0  ;;  %v556_v15 = vsel %vm122_vm0, %v508_v59, 0.0  ;;  %v449_v50 = vrot.slane %v1882_v56, 4  ;;  %v462_v16 = vrot.slane %v461_v54, 4 }
  0x6b   :  { %v475_v29 = vrot.slane %v474_v61, 4  ;;  %v568_v34 = vadd.f32 %v567_v28, %v566_v18  ;;  %v2559_v7 = vrot.slane %v1842_v21, 2  ;;  %v487_v49 = vadd.f32 %v486_v5, %v485_v20 }
  0x6c   :  { %v513_v52 = vmul.f32 %v2560_v53, %v1444_v30  ;;  %v569_v9 = vsel %vm122_vm0, %v512_v43, 0.0  ;;  %v520_v41 = vadd.f32 %v519_v25, %v518_v4  ;;  %v1944_v39 = vadd.f32 %v532_v8, %v531_v3  ;;  %v2562_v4 = vld [vmem:[#allocation15_spill] sm:$0xff] }
  0x6d   :  { %v1939_v51 = vadd.f32 %v2559_v7, %v1842_v21  ;;  %v544_v45 = vadd.f32 %v543_v58, %v542_v36  ;;  %v557_v59 = vadd.f32 %v556_v15, %v555_v2  ;;  %v2561_v6 = vrot.slane %v1840_v13, 1  ;;  %v2563_v3 = vld [vmem:[#allocation19_spill] sm:$0xff] }
  0x6e   :  { %v438_v46 = vrot.slane %v1921_v44, 2  ;;  %v545_v21 = vsel %vm122_vm0, %v505_v31, 0.0  ;;  %v558_v20 = vsel %vm122_vm0, %v509_v63, 0.0  ;;  %v1955_v30 = vadd.f32 %v449_v50, %v1882_v56 }
  0x6f   :  { %v1949_v47 = vadd.f32 %v2561_v6, %v1840_v13  ;;  %v1957_v5 = vadd.f32 %v462_v16, %v461_v54  ;;  %v1959_v37 = vadd.f32 %v475_v29, %v474_v61  ;;  %v570_v43 = vadd.f32 %v569_v9, %v568_v34  ;;  %v2564_v16 = vld [vmem:[#allocation20_spill] sm:$0xff] }
  0x70   :  { %v488_v18 = vrot.slane %v487_v49, 4  ;;  %v571_v28 = vsel %vm122_vm0, %v513_v52, 0.0  ;;  %v579_v13 = vmul.f32 %v2540_v19, %v2562_v4  ;;  %v580_v36 = vmul.f32 %v2541_v10, %v2563_v3 }
  0x71   :  { %v521_v31 = vrot.slane %v520_v41, 4  ;;  %v534_v63 = vrot.slane %v1944_v39, 4  ;;  %v1967_v2 = vadd.f32 %v545_v21, %v544_v45  ;;  %v1969_v56 = vadd.f32 %v558_v20, %v557_v59 }
  0x72   :  { %v581_v54 = vmul.f32 %v2544_v17, %v2564_v16  ;;  %v583_v34 = vmul.f32 %v2542_v32, %v2562_v4  ;;  %v584_v61 = vmul.f32 %v2543_v55, %v2563_v3  ;;  %v585_v19 = vmul.f32 %v2545_v23, %v2564_v16 }
  0x73   :  { %v1979_v10 = vadd.f32 %v571_v28, %v570_v43  ;;  %v582_v25 = vmul.f32 %v2550_v0, %v1676_v11  ;;  %v586_v8 = vmul.f32 %v2551_v40, %v1676_v11  ;;  %v587_v17 = vmul.f32 %v2546_v22, %v2562_v4 }
  0x74   :  { %v588_v32 = vmul.f32 %v2547_v14, %v2563_v3  ;;  %v589_v55 = vmul.f32 %v2552_v35, %v2564_v16  ;;  %v599_v58 = vsel %vm122_vm0, %v579_v13, 0.0  ;;  %v600_v23 = vsel %vm122_vm0, %v580_v36, 0.0 }
  0x75   :  { %v591_v15 = vmul.f32 %v2548_v1, %v2562_v4  ;;  %v592_v0 = vmul.f32 %v2549_v33, %v2563_v3  ;;  %v593_v40 = vmul.f32 %v2553_v57, %v2564_v16  ;;  %v601_v22 = vadd.f32 %v600_v23, %v599_v58 }
  0x76   :  { %v602_v50 = vsel %vm122_vm0, %v581_v54, 0.0  ;;  %v612_v14 = vsel %vm122_vm0, %v583_v34, 0.0  ;;  %v613_v35 = vsel %vm122_vm0, %v584_v61, 0.0  ;;  %v615_v29 = vsel %vm122_vm0, %v585_v19, 0.0 }
  0x77   :  { %v590_v7 = vmul.f32 %v2556_v24, %v1676_v11  ;;  %v594_v1 = vmul.f32 %v2557_v12, %v1676_v11  ;;  %v595_v33 = vmul.f32 %v2554_v27, %v2562_v4  ;;  %v614_v52 = vadd.f32 %v613_v35, %v612_v14 }
  0x78   :  { %v596_v57 = vmul.f32 %v2555_v38, %v2563_v3  ;;  %v625_v9 = vsel %vm122_vm0, %v587_v17, 0.0  ;;  %v626_v45 = vsel %vm122_vm0, %v588_v32, 0.0  ;;  %v628_v59 = vsel %vm122_vm0, %v589_v55, 0.0 }
  0x79   :  { %v603_v6 = vadd.f32 %v602_v50, %v601_v22  ;;  %v616_v21 = vadd.f32 %v615_v29, %v614_v52  ;;  %v627_v20 = vadd.f32 %v626_v45, %v625_v9  ;;  %v638_v24 = vsel %vm122_vm0, %v591_v15, 0.0 }
  0x7a   :  { %v604_v12 = vsel %vm122_vm0, %v582_v25, 0.0  ;;  %v617_v43 = vsel %vm122_vm0, %v586_v8, 0.0  ;;  %v639_v27 = vsel %vm122_vm0, %v592_v0, 0.0  ;;  %v641_v28 = vsel %vm122_vm0, %v593_v40, 0.0 }
  0x7b   :  { %v489_v38 = vadd.f32 %v488_v18, %v487_v49  ;;  %v522_v4 = vadd.f32 %v521_v31, %v520_v41  ;;  %v629_v13 = vadd.f32 %v628_v59, %v627_v20  ;;  %v640_v3 = vadd.f32 %v639_v27, %v638_v24 }
  0x7c   :  { %v597_v36 = vmul.f32 %v2558_v26, %v2564_v16  ;;  %v630_v54 = vsel %vm122_vm0, %v590_v7, 0.0  ;;  %v651_v34 = vsel %vm122_vm0, %v595_v33, 0.0  ;;  %v652_v61 = vsel %vm122_vm0, %v596_v57, 0.0 }
  0x7d   :  { %v535_v19 = vadd.f32 %v534_v63, %v1944_v39  ;;  %v605_v25 = vadd.f32 %v604_v12, %v603_v6  ;;  %v618_v8 = vadd.f32 %v617_v43, %v616_v21  ;;  %v642_v17 = vadd.f32 %v641_v28, %v640_v3 }
  0x7e   :  { %v547_v32 = vrot.slane %v1967_v2, 4  ;;  %v560_v49 = vrot.slane %v1969_v56, 4  ;;  %v573_v41 = vrot.slane %v1979_v10, 4  ;;  %v643_v18 = vsel %vm122_vm0, %v594_v1, 0.0 }
  0x7f   :  { %v451_v26 = vrot.slane %v1955_v30, 2  ;;  %v464_v31 = vrot.slane %v1957_v5, 2  ;;  %v631_v16 = vadd.f32 %v630_v54, %v629_v13  ;;  %v653_v55 = vadd.f32 %v652_v61, %v651_v34 }
  0x80   :  { %v477_v58 = vrot.slane %v1959_v37, 2  ;;  %v490_v39 = vrot.slane %v489_v38, 2  ;;  %v598_v63 = vmul.f32 %v2560_v53, %v1676_v11  ;;  %v654_v23 = vsel %vm122_vm0, %v597_v36, 0.0 }
  0x81   :  { %v523_v15 = vrot.slane %v522_v4, 2  ;;  %v606_v0 = vrot.slane %v605_v25, 4  ;;  %v619_v40 = vrot.slane %v618_v8, 4  ;;  %v644_v22 = vadd.f32 %v643_v18, %v642_v17 }
  0x82   :  { %v536_v50 = vrot.slane %v535_v19, 2  ;;  %v548_v14 = vadd.f32 %v547_v32, %v1967_v2  ;;  %v561_v35 = vadd.f32 %v560_v49, %v1969_v56  ;;  %v574_v29 = vadd.f32 %v573_v41, %v1979_v10 }
  0x83   :  { %v439_v7 = vadd.f32 %v438_v46, %v1921_v44  ;;  %v452_v1 = vadd.f32 %v451_v26, %v1955_v30  ;;  %v632_v11 = vrot.slane %v631_v16, 4  ;;  %v655_v53 = vadd.f32 %v654_v23, %v653_v55  ;;  %v2565_v23 = vld [vmem:[#allocation31_spill] sm:$0xff] }
  0x84   :  { %v465_v33 = vadd.f32 %v464_v31, %v1957_v5  ;;  %v478_v52 = vadd.f32 %v477_v58, %v1959_v37  ;;  %v491_v57 = vadd.f32 %v490_v39, %v489_v38  ;;  %v656_v9 = vsel %vm122_vm0, %v598_v63, 0.0 }
  0x85   :  { %v524_v2 = vadd.f32 %v523_v15, %v522_v4  ;;  %v607_v45 = vadd.f32 %v606_v0, %v605_v25  ;;  %v620_v56 = vadd.f32 %v619_v40, %v618_v8  ;;  %v645_v59 = vrot.slane %v644_v22, 4 }
  0x86   :  { %v537_v10 = vadd.f32 %v536_v50, %v535_v19  ;;  %v549_v6 = vrot.slane %v548_v14, 2  ;;  %v562_v21 = vrot.slane %v561_v35, 2  ;;  %v575_v20 = vrot.slane %v574_v29, 2  ;;  %v2566_v50 = vld [vmem:[#allocation36_spill] sm:$0xff] }
  0x87   :  { %v407_v44 = vrot.slane %v1939_v51, 1  ;;  %v440_v46 = vrot.slane %v439_v7, 1  ;;  %v633_v30 = vadd.f32 %v632_v11, %v631_v16  ;;  %v657_v24 = vadd.f32 %v656_v9, %v655_v53  ;;  %v2568_v53 = vld [vmem:[#allocation37_spill] sm:$0xff]  ;;  %v2570_v9 = vld [vmem:[#allocation12_spill] sm:$0xff] }
  0x88   :  { %v453_v12 = vrot.slane %v452_v1, 1  ;;  %v466_v5 = vrot.slane %v465_v33, 1  ;;  %v479_v43 = vrot.slane %v478_v52, 1  ;;  %v492_v37 = vrot.slane %v491_v57, 1 }
  0x89   :  { %v525_v27 = vrot.slane %v524_v2, 1  ;;  %v608_v28 = vrot.slane %v607_v45, 2  ;;  %v621_v38 = vrot.slane %v620_v56, 2  ;;  %v646_v4 = vadd.f32 %v645_v59, %v644_v22 }
  0x8a   :  { %v538_v13 = vrot.slane %v537_v10, 1  ;;  %v550_v3 = vadd.f32 %v549_v6, %v548_v14  ;;  %v563_v36 = vadd.f32 %v562_v21, %v561_v35  ;;  %v576_v54 = vadd.f32 %v575_v20, %v574_v29  ;;  %v2567_v35 = vld [vmem:[#allocation8_spill] sm:$0xff] }
  0x8b   :  { %v408_v34 = vadd.f32 %v407_v44, %v1939_v51  ;;  %v2047_v61 = vadd.f32 %v440_v46, %v439_v7  ;;  %v634_v19 = vrot.slane %v633_v30, 2  ;;  %v658_v25 = vrot.slane %v657_v24, 4 }
  0x8c   :  { %v2049_v8 = vadd.f32 %v453_v12, %v452_v1  ;;  %v2051_v17 = vadd.f32 %v466_v5, %v465_v33  ;;  %v2053_v32 = vadd.f32 %v479_v43, %v478_v52  ;;  %v2055_v49 = vadd.f32 %v492_v37, %v491_v57  ;;  %v2569_v52 = vld [vmem:[#allocation10_spill] sm:$0xff] }
  0x8d   :  { %v2057_v41 = vadd.f32 %v525_v27, %v524_v2  ;;  %v609_v18 = vadd.f32 %v608_v28, %v607_v45  ;;  %v622_v26 = vadd.f32 %v621_v38, %v620_v56  ;;  %v647_v31 = vrot.slane %v646_v4, 2  ;;  %v2571_v45 = vld [vmem:[#allocation5_spill] sm:$0xff] }
  0x8e   :  { %v2059_v16 = vadd.f32 %v538_v13, %v537_v10  ;;  %v551_v51 = vrot.slane %v550_v3, 1  ;;  %v564_v55 = vrot.slane %v563_v36, 1  ;;  %v577_v58 = vrot.slane %v576_v54, 1  ;;  %v1158_v10 = vld [vmem:[%s2416_s4 + $0x30] sm:$0x1f] }
  0x8f   :  { %v635_v39 = vadd.f32 %v634_v19, %v633_v30  ;;  %v659_v63 = vadd.f32 %v658_v25, %v657_v24  ;;  %v668_v15 = vadd.f32 %v1802_v60, %v2565_v23  ;;  %v673_v0 = vmul.f32 2.0, %v1838_v62  ;;  %v1153_v62 = vld [vmem:[%s2416_s4 + $0x8] sm:$0x1f] }
  0x90   :  { %v2066_v40 = vadd.f32 %v1802_v60, %v1800_v48  ;;  %v2069_v22 = vmul.f32 2.0, %v1804_v42  ;;  %v669_v14 = vadd.f32 %v1802_v60, %v2566_v50  ;;  %v674_v29 = vmul.f32 2.0, %v2567_v35  ;;  %v1154_v42 = vld [vmem:[%s2416_s4 + $0x10] sm:$0x1f]  ;;  %v1157_v13 = vld [vmem:[%s2416_s4 + $0x28] sm:$0x1f] }
  0x91   :  { %v610_v7 = vrot.slane %v609_v18, 1  ;;  %v623_v1 = vrot.slane %v622_v26, 1  ;;  %v648_v11 = vadd.f32 %v647_v31, %v646_v4  ;;  %v670_v33 = vadd.f32 %v1802_v60, %v2568_v53 }
  0x92   :  { %v2084_v57 = vadd.f32 %v1802_v60, %v2569_v52  ;;  %v2088_v2 = vadd.f32 %v1802_v60, %v2570_v9  ;;  %v675_v56 = vmul.f32 2.0, %v2571_v45  ;;  %v2092_v59 = vmul.f32 2.0, %v1949_v47 }
  0x93   :  { %v636_v6 = vrot.slane %v635_v39, 1  ;;  %v660_v21 = vrot.slane %v659_v63, 2  ;;  %v2097_v20 = vmul.f32 2.0, %v408_v34  ;;  %v678_v44 = vsub.f32 %v668_v15, %v673_v0 }
  0x94   :  { %v552_v46 = vadd.f32 %v551_v51, %v550_v3  ;;  %v2099_v30 = vadd.f32 %v564_v55, %v563_v36  ;;  %v2101_v24 = vadd.f32 %v577_v58, %v576_v54  ;;  %v679_v12 = vsub.f32 %v669_v14, %v674_v29 }
  0x95   :  { %v611_v5 = vadd.f32 %v610_v7, %v609_v18  ;;  %v624_v43 = vadd.f32 %v623_v1, %v622_v26  ;;  %v649_v37 = vrot.slane %v648_v11, 1  ;;  %v666_v47 = vsub.f32 %v2066_v40, %v2069_v22  ;;  %v2572_v1 = vld [vmem:[#allocation39_spill] sm:$0xff] }
  0x96   :  { %v680_v27 = vsub.f32 %v670_v33, %v675_v56  ;;  %v681_v28 = vsub.f32 %v2084_v57, %v2092_v59  ;;  %v758_v38 = vsub.f32 %v1158_v10, %v1153_v62  ;;  %v760_v4 = vsub.f32 %v1158_v10, %v1154_v42 }
  0x97   :  { %v637_v3 = vadd.f32 %v636_v6, %v635_v39  ;;  %v661_v36 = vadd.f32 %v660_v21, %v659_v63  ;;  %v682_v54 = vsub.f32 %v2088_v2, %v2097_v20  ;;  %v2112_v34 = vsub.f32 0.0, %v678_v44  ;;  %v2574_v6 = vld [vmem:[#allocation11_spill] sm:$0xff] }
  0x98   :  { %v2114_v19 = vsub.f32 0.0, %v679_v12  ;;  %v688_v25 = vadd.f32 %v1800_v48, %v2565_v23  ;;  %v759_v18 = vand.u32 2147483647, %v758_v38  ;;  %v761_v26 = vand.u32 2147483647, %v760_v4 }
  0x99   :  { %v650_v31 = vadd.f32 %v649_v37, %v648_v11  ;;  %v689_v51 = vadd.f32 %v1800_v48, %v2566_v50  ;;  %v690_v55 = vadd.f32 %v1800_v48, %v2568_v53  ;;  %v691_v58 = vadd.f32 %v1800_v48, %v2569_v52  ;;  %v2573_v11 = vld [vmem:[#allocation40_spill] sm:$0xff] }
  0x9a   :  { %v741_v39 = vmul.f32 2.0, %v611_v5  ;;  %v742_v63 = vmul.f32 2.0, %v624_v43  ;;  %v762_v15 = vmul.f32 %v1157_v13, %v759_v18  ;;  %v765_v0 = vmul.f32 %v1157_v13, %v761_v26  ;;  %v2575_v43 = vld [vmem:[#allocation41_spill] sm:$0xff]  ;;  %v2576_v18 = vld [vmem:[#allocation42_spill] sm:$0xff] }
  0x9b   :  { %v662_v14 = vrot.slane %v661_v36, 1  ;;  %v692_v35 = vadd.f32 %v1800_v48, %v2570_v9  ;;  %v693_v29 = vmul.f32 2.0, %v2047_v61  ;;  %v694_v7 = vmul.f32 2.0, %v2049_v8 }
  0x9c   :  { %v714_v33 = vsel %vm713_vm2, %v2573_v11, %v2572_v1  ;;  %v763_v62 = vmul.f32 1.442695, %v762_v15  ;;  %v766_v42 = vmul.f32 1.442695, %v765_v0  ;;  %v695_v57 = vmul.f32 2.0, %v2051_v17 }
  0x9d   :  { %v696_v2 = vmul.f32 2.0, %v2053_v32  ;;  %v743_v45 = vmul.f32 2.0, %v637_v3  ;;  %v723_v56 = vmul.f32 2.0, %v2057_v41  ;;  %v724_v59 = vmul.f32 2.0, %v2059_v16 }
  0x9e   :  { %v751_v61 = vsel %vm713_vm2, %v742_v63, %v741_v39  ;;  %1165 = vpow2.f32 %v763_v62  ;;  %v663_v8 = vadd.f32 %v662_v14, %v661_v36  ;;  %v697_v10 = vmul.f32 2.0, %v2055_v49 }
  0x9f   :  { %v716_v21 = vsel %vm715_vm3, %v2574_v6, %v714_v33  ;;  %1167 = vpow2.f32 %v766_v42  ;;  %v685_v20 = vsub.f32 0.0, %v680_v27  ;;  %v698_v17 = vsub.f32 %v688_v25, %v693_v29 }
  0xa0   :  { %v699_v44 = vsub.f32 %v689_v51, %v694_v7  ;;  %v744_v32 = vmul.f32 2.0, %v650_v31  ;;  %v700_v12 = vsub.f32 %v690_v55, %v695_v57  ;;  %v725_v5 = vmul.f32 2.0, %v552_v46 }
  0xa1   :  { %v752_v41 = vsel %vm715_vm3, %v743_v45, %v751_v61  ;;  %v701_v16 = vsub.f32 %v691_v58, %v696_v2  ;;  %v718_v37 = vsel %vm717_vm4, %v2575_v43, %v716_v21  ;;  %v733_v38 = vsel %vm713_vm2, %v724_v59, %v723_v56 }
  0xa2   :  { %v870_v49 = vsel %vm713_vm2, %v2566_v50, %v2565_v23  ;;  %v686_v4 = vsub.f32 0.0, %v681_v28  ;;  %v687_v27 = vsub.f32 0.0, %v682_v54  ;;  %v702_v13 = vsub.f32 %v692_v35, %v697_v10  ;;  %v1156_v23 = vld [vmem:[%s2416_s4 + $0x20] sm:$0x1f]  ;;  %v1155_v35 = vld [vmem:[%s2416_s4 + $0x18] sm:$0x1f] }
  0xa3   :  { %v745_v3 = vmul.f32 2.0, %v663_v8  ;;  %v726_v36 = vmul.f32 2.0, %v2099_v30  ;;  %v753_v46 = vsel %vm717_vm4, %v744_v32, %v752_v41  ;;  %v703_v25 = vsub.f32 0.0, %v698_v17 }
  0xa4   :  { %v720_v26 = vsel %vm719_vm5, %v2576_v18, %v718_v37  ;;  %v734_v31 = vsel %vm715_vm3, %v725_v5, %v733_v38  ;;  %v871_v51 = vsel %vm715_vm3, %v2568_v53, %v870_v49  ;;  %v704_v50 = vsub.f32 0.0, %v699_v44 }
  0xa5   :  { %v705_v28 = vsub.f32 0.0, %v700_v12  ;;  %v706_v54 = vsub.f32 0.0, %v701_v16  ;;  %v2157_v30 = vadd.f32 %v720_v26, %v1802_v60  ;;  %v707_v55 = vsub.f32 0.0, %v702_v13 }
  0xa6   :  { %v2160_v58 = vsel %vm719_vm5, %v745_v3, %v753_v46  ;;  %v1231_v39 = vmov 1966171168   ;;  %v896_v15 = vlaneseq  ;;  %v2163_v0 = vadd.f32 %v720_v26, %v1800_v48 }
  0xa7   :  { %v894_v63 = vunpack.c.l.s4 %v1231_v39  ;;  %v2166_v53 = vmul.f32 2.0, %v2101_v24  ;;  %v2169_v14 = vsel %vm717_vm4, %v726_v36, %v734_v31  ;;  %v872_v60 = vsel %vm717_vm4, %v2569_v52, %v871_v51 }
  0xa8   :  { %v784_v29 = vrot.slane %v1156_v23, 1  ;;  %v785_v7 = vrot.slane %v1156_v23, 2  ;;  %v786_v33 = vrot.slane %v1156_v23, 3  ;;  %v787_v62 = vrot.slane %v1156_v23, 4 }
  0xa9   :  { %v814_v42 = vrot.slane %v1155_v35, 1  ;;  %v815_v24 = vrot.slane %v1155_v35, 2  ;;  %v816_v57 = vrot.slane %v1155_v35, 3  ;;  %v817_v45 = vrot.slane %v1155_v35, 4 }
  0xaa   :  { %v873_v56 = vsel %vm719_vm5, %v2570_v9, %v872_v60  ;;  %v895_v52 = vunpack.c.0.s8 %v894_v63  ;;  %v897_v59 = vshrl.u32 %v896_v15, 7  ;;  %v2577_v60 = vld [vmem:[#allocation43_spill] sm:$0xff] }
  0xab   :  { %v1166_v2 = vpop.eup %1165 }
  0xac   :  { %v1168_v61 = vpop.eup %1167  ;;  %v769_v8 = vrot.slane %v1166_v2, 1  ;;  %v770_v10 = vrot.slane %v1166_v2, 2  ;;  %v771_v21 = vrot.slane %v1166_v2, 3  ;;  %v772_v17 = vrot.slane %v1166_v2, 4 }
  0xad   :  { %v778_v44 = vmul.f32 %v1166_v2, %v2112_v34  ;;  %v799_v32 = vrot.slane %v1168_v61, 1  ;;  %v800_v12 = vrot.slane %v1168_v61, 2  ;;  %v801_v5 = vrot.slane %v1168_v61, 3 }
  0xae   :  { %v779_v41 = vmul.f32 %v769_v8, %v2114_v19  ;;  %v780_v16 = vmul.f32 %v770_v10, %v685_v20  ;;  %v781_v37 = vmul.f32 %v771_v21, %v686_v4  ;;  %v782_v38 = vmul.f32 %v772_v17, %v687_v27 }
  0xaf   :  { %v793_v49 = vmul.f32 %v1156_v23, %v778_v44  ;;  %v802_v13 = vrot.slane %v1168_v61, 4  ;;  %v808_v9 = vmul.f32 %v1168_v61, %v703_v25  ;;  %v809_v3 = vmul.f32 %v799_v32, %v704_v50 }
  0xb0   :  { %v794_v36 = vmul.f32 %v784_v29, %v779_v41  ;;  %v795_v46 = vmul.f32 %v785_v7, %v780_v16  ;;  %v796_v26 = vmul.f32 %v786_v33, %v781_v37  ;;  %v797_v31 = vmul.f32 %v787_v62, %v782_v38 }
  0xb1   :  { %v810_v51 = vmul.f32 %v800_v12, %v705_v28  ;;  %v811_v39 = vmul.f32 %v801_v5, %v706_v54  ;;  %v812_v63 = vmul.f32 %v802_v13, %v707_v55  ;;  %v823_v34 = vmul.f32 %v1155_v35, %v808_v9 }
  0xb2   :  { %v824_v15 = vmul.f32 %v814_v42, %v809_v3  ;;  %v856_v48 = vmul.f32 %v1166_v2, %v2577_v60  ;;  %v883_v19 = vmul.f32 %v1168_v61, %v2577_v60  ;;  %v933_v20 = vsub.s32 0, %v897_v59 }
  0xb3   :  { %v825_v4 = vmul.f32 %v815_v24, %v810_v51  ;;  %v826_v27 = vmul.f32 %v816_v57, %v811_v39  ;;  %v827_v23 = vmul.f32 %v817_v45, %v812_v63  ;;  %v898_v8 = vsub.s32 %v895_v52, %v897_v59 }
  0xb4   :  { %v828_v25 = vadd.f32 %v823_v34, %v793_v49  ;;  %v829_v50 = vadd.f32 %v824_v15, %v794_v36  ;;  %v857_v29 = vmul.f32 %v1155_v35, %v856_v48  ;;  %v884_v7 = vsel %vm82_vm1, %v883_v19, 0.0 }
  0xb5   :  { %v830_v33 = vadd.f32 %v825_v4, %v795_v46  ;;  %v831_v28 = vadd.f32 %v826_v27, %v796_v26  ;;  %v832_v54 = vadd.f32 %v827_v23, %v797_v31  ;;  %v885_v55 = vrot.slane %v884_v7, 4 }
  0xb6   :  { %v838_v62 = vrot.slane %v829_v50, 7  ;;  %v858_v42 = vsel %vm82_vm1, %v857_v29, 0.0  ;;  %v875_v2 = vmul.f32 %v873_v56, %v857_v29  ;;  %v892_v10 = vcombine.high %v857_v29, %v857_v29  ;;  %v1169_v50 = vld [vmem:[%s2414_s2] sm:$0xff] }
  0xb7   :  { %v840_v61 = vrot.slane %v830_v33, 6  ;;  %v842_v21 = vrot.slane %v831_v28, 5  ;;  %v844_v24 = vrot.slane %v832_v54, 4  ;;  %v859_v57 = vrot.slane %v858_v42, 4  ;;  %v1171_v33 = vld [vmem:[%s2414_s2 + $0x10] sm:$0xff] }
  0xb8   :  { %v839_v45 = vsel %vm713_vm2, %v838_v62, %v828_v25  ;;  %v876_v52 = vsel %vm82_vm1, %v875_v2, 0.0  ;;  %v886_v35 = vadd.f32 %v885_v55, %v884_v7  ;;  %v899_v48 = vrot.slane %v857_v29, %v898_v8  ;;  %v1173_v62 = vld [vmem:[%s2414_s2 + $0x20] sm:$0xff]  ;;  %v1174_v2 = vld [vmem:[%s2414_s2 + $0x28] sm:$0xff] }
  0xb9   :  { %v841_v59 = vsel %vm715_vm3, %v840_v61, %v839_v45  ;;  %v860_v17 = vadd.f32 %v859_v57, %v858_v42  ;;  %v877_v44 = vrot.slane %v876_v52, 4  ;;  %v906_v32 = vrot.slane %v892_v10, %v898_v8  ;;  %v1175_v61 = vld [vmem:[%s2414_s2 + $0x40] sm:$0xff]  ;;  %v1177_v45 = vld [vmem:[%s2414_s2 + $0x38] sm:$0xff] }
  0xba   :  { %v843_v12 = vsel %vm717_vm4, %v842_v21, %v841_v59  ;;  %v887_v5 = vrot.slane %v886_v35, 2  ;;  %v907_v56 = vcombine.high %v899_v48, %v899_v48  ;;  %v914_v41 = vrot.slane %v899_v48, %v898_v8  ;;  %v1179_v59 = vld [vmem:[%s2414_s2 + $0x50] sm:$0xff] }
  0xbb   :  { %v845_v16 = vsel %vm719_vm5, %v844_v24, %v843_v12  ;;  %v861_v37 = vrot.slane %v860_v17, 2  ;;  %v878_v38 = vadd.f32 %v877_v44, %v876_v52  ;;  %v921_v49 = vrot.slane %v906_v32, %v898_v8  ;;  %v1176_v24 = vld [vmem:[%s2414_s2 + $0x30] sm:$0xff]  ;;  %v1180_v32 = vld [vmem:[%s2414_s2 + $0x58] sm:$0xff] }
  0xbc   :  { %v847_v13 = vmul.f32 %v845_v16, %v2577_v60  ;;  %v888_v9 = vadd.f32 %v887_v5, %v886_v35  ;;  %v928_v3 = vrot.slane %v907_v56, %v898_v8  ;;  %v929_v36 = vcombine.high %v914_v41, %v914_v41  ;;  %v1178_v35 = vld [vmem:[%s2414_s2 + $0x48] sm:$0xff]  ;;  %v1181_v5 = vld [vmem:[%s2414_s2 + $0x60] sm:$0xff] }
  0xbd   :  { %v2195_v46 = vsel %vm719_vm5, %v2166_v53, %v2169_v14  ;;  %v862_v26 = vadd.f32 %v861_v37, %v860_v17  ;;  %v879_v31 = vrot.slane %v878_v38, 2  ;;  %v934_v51 = vrot.slane %v914_v41, %v933_v20  ;;  %v1182_v41 = vld [vmem:[%s2414_s2 + $0x68] sm:$0xff]  ;;  %v1183_v37 = vld [vmem:[%s2414_s2 + $0x70] sm:$0xff] }
  0xbe   :  { %v2200_v39 = vsub.f32 0.0, %v666_v47  ;;  %v848_v63 = vsel %vm82_vm1, %v847_v13, 0.0  ;;  %v889_v34 = vrot.slane %v888_v9, 1  ;;  %v930_v15 = vcombine.high %v928_v3, %v928_v3 }
  0xbf   :  { %v849_v60 = vrot.slane %v848_v63, 4  ;;  %v863_v19 = vrot.slane %v862_v26, 1  ;;  %v938_v4 = vrot.slane %v928_v3, %v933_v20  ;;  %v942_v27 = vrot.slane %v929_v36, %v933_v20  ;;  %v1186_v36 = vld [vmem:[%s2414_s2 + $0x88] sm:$0xff] }
  0xc0   :  { %v738_v53 = vsub.f32 %v2163_v0, %v2195_v46  ;;  %v2578_v14 = vsub.f32 %v2157_v30, %v2160_v58  ;;  %v2210_v8 = vadd.f32 %v879_v31, %v878_v38  ;;  %v950_v40 = vrot.slane %v921_v49, %v933_v20  ;;  %v1170_v30 = vld [vmem:[%s2414_s2 + $0x8] sm:$0xff]  ;;  %v1184_v49 = vld [vmem:[%s2414_s2 + $0x78] sm:$0xff] }
  0xc1   :  { %v850_v22 = vadd.f32 %v849_v60, %v848_v63  ;;  %v2212_v47 = vadd.f32 %v889_v34, %v888_v9  ;;  %v946_v25 = vrot.slane %v930_v15, %v933_v20  ;;  %v956_v29 = vmul.f32 %v1169_v50, %v934_v51  ;;  %v1172_v20 = vld [vmem:[%s2414_s2 + $0x18] sm:$0xff]  ;;  %v1185_v9 = vld [vmem:[%s2414_s2 + $0x80] sm:$0xff]  ;;  %v1187_v15 = vld [vmem:[%s2414_s2 + $0x90] sm:$0xff] }
  0xc2   :  { %v2208_v23 = vsub.f32 0.0, %v2578_v14  ;;  %v2217_v7 = vadd.f32 %v863_v19, %v862_v26  ;;  %v957_v58 = vmul.f32 %v1170_v30, %v934_v51  ;;  %v958_v28 = vmul.f32 %v1171_v33, %v934_v51  ;;  %v1188_v19 = vld [vmem:[%s2414_s2 + $0x98] sm:$0xff] }
  0xc3   :  { %v959_v54 = vmul.f32 %v1172_v20, %v934_v51  ;;  %v851_v55 = vrot.slane %v850_v22, 2  ;;  %v960_v42 = vmul.f32 %v1173_v62, %v938_v4  ;;  %v961_v10 = vmul.f32 %v1174_v2, %v938_v4 }
  0xc4   :  { %v964_v21 = vmul.f32 %v1175_v61, %v942_v27  ;;  %v962_v57 = vmul.f32 %v1176_v24, %v938_v4  ;;  %v963_v52 = vmul.f32 %v1177_v45, %v938_v4  ;;  %v965_v48 = vmul.f32 %v1178_v35, %v942_v27 }
  0xc5   :  { %v966_v17 = vmul.f32 %v1179_v59, %v942_v27  ;;  %v852_v44 = vadd.f32 %v851_v55, %v850_v22  ;;  %v967_v12 = vmul.f32 %v1180_v32, %v942_v27  ;;  %v968_v56 = vmul.f32 %v1181_v5, %v946_v25 }
  0xc6   :  { %v969_v16 = vmul.f32 %v1182_v41, %v946_v25  ;;  %v970_v38 = vmul.f32 %v1183_v37, %v946_v25  ;;  %v971_v13 = vmul.f32 %v1184_v49, %v946_v25  ;;  %v972_v3 = vmul.f32 %v1185_v9, %v950_v40 }
  0xc7   :  { %v973_v26 = vmul.f32 %v1186_v36, %v950_v40  ;;  %v853_v31 = vrot.slane %v852_v44, 1  ;;  %v976_v51 = vsel %vm122_vm0, %v956_v29, 0.0  ;;  %v977_v63 = vsel %vm122_vm0, %v960_v42, 0.0 }
  0xc8   :  { %v979_v34 = vsel %vm122_vm0, %v964_v21, 0.0  ;;  %v974_v60 = vmul.f32 %v1187_v15, %v950_v40  ;;  %v975_v4 = vmul.f32 %v1188_v19, %v950_v40  ;;  %v978_v27 = vadd.f32 %v977_v63, %v976_v51  ;;  %v1194_v63 = vld [vmem:[%s2415_s3 + $0x80] sm:$0xff]  ;;  %v1195_v15 = vld [vmem:[%s2415_s3 + $0x28] sm:$0xff] }
  0xc9   :  { %v985_v14 = vsel %vm122_vm0, %v957_v58, 0.0  ;;  %v854_v22 = vadd.f32 %v853_v31, %v852_v44  ;;  %v981_v25 = vsel %vm122_vm0, %v968_v56, 0.0  ;;  %v986_v50 = vsel %vm122_vm0, %v961_v10, 0.0  ;;  %v1193_v31 = vld [vmem:[%s2415_s3 + $0x8] sm:$0xff] }
  0xca   :  { %v988_v29 = vsel %vm122_vm0, %v965_v48, 0.0  ;;  %v980_v30 = vadd.f32 %v979_v34, %v978_v27  ;;  %v983_v33 = vsel %vm122_vm0, %v972_v3, 0.0  ;;  %v987_v20 = vadd.f32 %v986_v50, %v985_v14  ;;  %v1198_v14 = vld [vmem:[%s2415_s3 + $0x88] sm:$0xff]  ;;  %v1199_v50 = vld [vmem:[%s2415_s3 + $0x10] sm:$0xff] }
  0xcb   :  { %v994_v55 = vsel %vm122_vm0, %v958_v28, 0.0  ;;  %v855_v62 = vadd.f32 %v854_v22, %v2200_v39  ;;  %v990_v40 = vsel %vm122_vm0, %v969_v16, 0.0  ;;  %v995_v42 = vsel %vm122_vm0, %v962_v57, 0.0  ;;  %v1190_v16 = vld [vmem:[%s2415_s3 + $0x20] sm:$0xff] }
  0xcc   :  { %v997_v58 = vsel %vm122_vm0, %v966_v17, 0.0  ;;  %v982_v2 = vadd.f32 %v981_v25, %v980_v30  ;;  %v989_v61 = vadd.f32 %v988_v29, %v987_v20  ;;  %v992_v10 = vsel %vm122_vm0, %v973_v26, 0.0  ;;  %v1200_v30 = vld [vmem:[%s2415_s3 + $0x30] sm:$0xff] }
  0xcd   :  { %v996_v21 = vadd.f32 %v995_v42, %v994_v55  ;;  %v999_v24 = vsel %vm122_vm0, %v970_v38, 0.0  ;;  %v1003_v45 = vsel %vm122_vm0, %v959_v54, 0.0  ;;  %v1004_v35 = vsel %vm122_vm0, %v963_v52, 0.0  ;;  %1137 = vst.msk [vmem:[#allocation2] sm:$0x1] %vm1136_vm6, %v855_v62  ;;  %v1189_v52 = vld [vmem:[%s2415_s3] sm:$0xff] }
  0xce   :  { %v1006_v28 = vsel %vm122_vm0, %v967_v12, 0.0  ;;  %v984_v39 = vadd.f32 %v983_v33, %v982_v2  ;;  %v991_v48 = vadd.f32 %v990_v40, %v989_v61  ;;  %v1005_v59 = vadd.f32 %v1004_v35, %v1003_v45  ;;  %v1191_v38 = vld [vmem:[%s2415_s3 + $0x40] sm:$0xff]  ;;  %v1201_v55 = vld [vmem:[%s2415_s3 + $0x50] sm:$0xff]  ;;  %v1203_v61 = vld [vmem:[%s2415_s3 + $0x18] sm:$0xff] }
  0xcf   :  { %v998_v57 = vadd.f32 %v997_v58, %v996_v21  ;;  %v881_v17 = vrot.slane %v2210_v8, 1  ;;  %v1001_v44 = vsel %vm122_vm0, %v974_v60, 0.0  ;;  %v1008_v32 = vsel %vm122_vm0, %v971_v13, 0.0  ;;  %v1192_v13 = vld [vmem:[%s2415_s3 + $0x60] sm:$0xff]  ;;  %v1202_v40 = vld [vmem:[%s2415_s3 + $0x70] sm:$0xff]  ;;  %v1204_v21 = vld [vmem:[%s2415_s3 + $0x38] sm:$0xff] }
  0xd0   :  { %v1010_v5 = vsel %vm122_vm0, %v975_v4, 0.0  ;;  %v993_v56 = vadd.f32 %v992_v10, %v991_v48  ;;  %v1007_v41 = vadd.f32 %v1006_v28, %v1005_v59  ;;  %v1012_v12 = vmul.f32 %v1189_v52, %v984_v39  ;;  %v1197_v4 = vld [vmem:[%s2415_s3 + $0x68] sm:$0xff]  ;;  %v1205_v45 = vld [vmem:[%s2415_s3 + $0x58] sm:$0xff]  ;;  %v1206_v28 = vld [vmem:[%s2415_s3 + $0x90] sm:$0xff] }
  0xd1   :  { %v1000_v54 = vadd.f32 %v999_v24, %v998_v57  ;;  %v1016_v37 = vmul.f32 %v1190_v16, %v984_v39  ;;  %v1020_v49 = vmul.f32 %v1191_v38, %v984_v39  ;;  %v1024_v9 = vmul.f32 %v1192_v13, %v984_v39  ;;  %v1207_v48 = vld [vmem:[%s2415_s3 + $0x78] sm:$0xff] }
  0xd2   :  { %v2313_v3 = vmul.f32 %v2217_v7, %v2573_v11  ;;  %v1009_v26 = vadd.f32 %v1008_v32, %v1007_v41  ;;  %v1013_v51 = vmul.f32 %v1193_v31, %v993_v56  ;;  %v1028_v34 = vmul.f32 %v1194_v63, %v984_v39  ;;  %v1196_v11 = vld [vmem:[%s2415_s3 + $0x48] sm:$0xff]  ;;  %v1208_v38 = vld [vmem:[%s2415_s3 + $0x98] sm:$0xff]  ;;  %s1232_s3 = smov [#allocation2]  }
  0xd3   :  { %v1002_v36 = vadd.f32 %v1001_v44, %v1000_v54  ;;  %v1017_v60 = vmul.f32 %v1195_v15, %v993_v56  ;;  %v1021_v19 = vmul.f32 %v1196_v11, %v993_v56  ;;  %v1025_v27 = vmul.f32 %v1197_v4, %v993_v56  ;;  %s1145_s19 = sshll.u32 %s1232_s3, 4  ;;  %s1146_s19 = int_to_ptr.vmem [resolvable:$true] %s1145_s19 }
  0xd4   :  { %v1029_v22 = vmul.f32 %v1198_v14, %v993_v56  ;;  %v1011_v25 = vadd.f32 %v1010_v5, %v1009_v26  ;;  %v1032_v20 = vsel %vm122_vm0, %v1012_v12, 0.0  ;;  %v1033_v58 = vsel %vm122_vm0, %v1013_v51, 0.0  ;;  %s1209_s20 = scalar_lea.vmem %s1146_s19, 128  ;;  %p1214_p1 = scmp.lt.s32.totalorder %s1146_s19, %s1146_s19 }
  0xd5   :  { %v1014_v29 = vmul.f32 %v1199_v50, %v1002_v36  ;;  %v1018_v33 = vmul.f32 %v1200_v30, %v1002_v36  ;;  %v1022_v62 = vmul.f32 %v1201_v55, %v1002_v36  ;;  %v1026_v42 = vmul.f32 %v1202_v40, %v1002_v36  ;;  %p1210_p0 = scmp.ne.s32.totalorder %s1146_s19, %s1209_s20  ;;  %p1215_p2 = scmp.lt.s32.totalorder %s1209_s20, %s1209_s20 }
  0xd6   :  { %v1045_v2 = vsel %vm122_vm0, %v1016_v37, 0.0  ;;  %v1015_v10 = vmul.f32 %v1203_v61, %v1011_v25  ;;  %v1019_v24 = vmul.f32 %v1204_v21, %v1011_v25  ;;  %v1023_v35 = vmul.f32 %v1205_v45, %v1011_v25 }
  0xd7   :  { %v1030_v39 = vmul.f32 %v1206_v28, %v1002_v36  ;;  %v1027_v57 = vmul.f32 %v1207_v48, %v1011_v25  ;;  %v1034_v59 = vadd.f32 %v1033_v58, %v1032_v20  ;;  %v1035_v44 = vsel %vm122_vm0, %v1014_v29, 0.0  ;;  %p1216_p3 = por %p1215_p2, %p1214_p1 }
  0xd8   :  { %v1046_v32 = vsel %vm122_vm0, %v1017_v60, 0.0  ;;  %v1037_v5 = vsel %vm122_vm0, %v1015_v10, 0.0  ;;  %v1048_v54 = vsel %vm122_vm0, %v1018_v33, 0.0  ;;  %v1050_v41 = vsel %vm122_vm0, %v1019_v24, 0.0 }
  0xd9   :  { %v1047_v56 = vadd.f32 %v1046_v32, %v1045_v2  ;;  %v1036_v52 = vadd.f32 %v1035_v44, %v1034_v59  ;;  %v1058_v12 = vsel %vm122_vm0, %v1020_v49, 0.0  ;;  %v1059_v16 = vsel %vm122_vm0, %v1021_v19, 0.0  ;;  %p1217_p4 = pnand %p1216_p3, %p1210_p0 }
  0xda   :  { %v1061_v37 = vsel %vm122_vm0, %v1022_v62, 0.0  ;;  %v1031_v13 = vmul.f32 %v1208_v38, %v1011_v25  ;;  %v1060_v26 = vadd.f32 %v1059_v16, %v1058_v12  ;;  %v1071_v31 = vsel %vm122_vm0, %v1024_v9, 0.0 }
  0xdb   :  { %v1049_v36 = vadd.f32 %v1048_v54, %v1047_v56  ;;  %v1038_v51 = vadd.f32 %v1037_v5, %v1036_v52  ;;  %v1063_v63 = vsel %vm122_vm0, %v1023_v35, 0.0  ;;  %v1072_v15 = vsel %vm122_vm0, %v1025_v27, 0.0 }
  0xdc   :  { %v1074_v49 = vsel %vm122_vm0, %v1026_v42, 0.0  ;;  %v1062_v11 = vadd.f32 %v1061_v37, %v1060_v26  ;;  %v1073_v19 = vadd.f32 %v1072_v15, %v1071_v31  ;;  %v1084_v4 = vsel %vm122_vm0, %v1028_v34, 0.0 }
  0xdd   :  { %v1051_v60 = vadd.f32 %v1050_v41, %v1049_v36  ;;  %v1039_v14 = vrot.slane %v1038_v51, 4  ;;  %v1076_v50 = vsel %vm122_vm0, %v1027_v57, 0.0  ;;  %v1085_v25 = vsel %vm122_vm0, %v1029_v22, 0.0 }
  0xde   :  { %v1087_v29 = vsel %vm122_vm0, %v1030_v39, 0.0  ;;  %v1064_v30 = vadd.f32 %v1063_v63, %v1062_v11  ;;  %v1075_v33 = vadd.f32 %v1074_v49, %v1073_v19  ;;  %v1086_v20 = vadd.f32 %v1085_v25, %v1084_v4 }
  0xdf   :  { %v1052_v9 = vrot.slane %v1051_v60, 4  ;;  %v1040_v55 = vadd.f32 %v1039_v14, %v1038_v51  ;;  %v1089_v27 = vsel %vm122_vm0, %v1031_v13, 0.0  ;;  %v1098_v62 = vmul.f32 %v2217_v7, %v2572_v1 }
  0xe0   :  { %v1100_v34 = vmul.f32 %v2217_v7, %v2574_v6  ;;  %v1065_v42 = vrot.slane %v1064_v30, 4  ;;  %v1077_v58 = vadd.f32 %v1076_v50, %v1075_v33  ;;  %v1088_v2 = vadd.f32 %v1087_v29, %v1086_v20 }
  0xe1   :  { %v1053_v40 = vadd.f32 %v1052_v9, %v1051_v60  ;;  %v1041_v22 = vrot.slane %v1040_v55, 2  ;;  %v1101_v61 = vmul.f32 %v2217_v7, %v2575_v43  ;;  %v1108_v10 = vrot.slane %v2313_v3, 7 }
  0xe2   :  { %v1110_v21 = vrot.slane %v1100_v34, 6  ;;  %v1066_v45 = vadd.f32 %v1065_v42, %v1064_v30  ;;  %v1078_v35 = vrot.slane %v1077_v58, 4  ;;  %v1090_v28 = vadd.f32 %v1089_v27, %v1088_v2 }
  0xe3   :  { %v1054_v24 = vrot.slane %v1053_v40, 2  ;;  %v1042_v39 = vadd.f32 %v1041_v22, %v1040_v55  ;;  %v1102_v1 = vmul.f32 %v2217_v7, %v2576_v18  ;;  %v1109_v6 = vsel %vm713_vm2, %v1108_v10, %v1098_v62 }
  0xe4   :  { %v1134_v48 = vmul.f32 %v2212_v47, %v2208_v23  ;;  %v1067_v59 = vrot.slane %v1066_v45, 2  ;;  %v1079_v44 = vadd.f32 %v1078_v35, %v1077_v58  ;;  %v1091_v43 = vrot.slane %v1090_v28, 4 }
  0xe5   :  { %v1055_v57 = vadd.f32 %v1054_v24, %v1053_v40  ;;  %v1043_v32 = vrot.slane %v1042_v39, 1  ;;  %v1111_v3 = vsel %vm715_vm3, %v1110_v21, %v1109_v6  ;;  %v1112_v5 = vrot.slane %v1101_v61, 5 }
  0xe6   :  { %v1068_v54 = vadd.f32 %v1067_v59, %v1066_v45  ;;  %v1080_v41 = vrot.slane %v1079_v44, 2  ;;  %v1092_v52 = vadd.f32 %v1091_v43, %v1090_v28  ;;  %v739_v18 = vsub.f32 0.0, %v738_v53 }
  0xe7   :  { %v1056_v56 = vrot.slane %v1055_v57, 1  ;;  %v882_v23 = vadd.f32 %v881_v17, %v2210_v8  ;;  %v1044_v47 = vadd.f32 %v1043_v32, %v1042_v39  ;;  %v1114_v7 = vrot.slane %v1102_v1, 4 }
  0xe8   :  { %v1069_v16 = vrot.slane %v1068_v54, 1  ;;  %v1081_v37 = vadd.f32 %v1080_v41, %v1079_v44  ;;  %v1093_v38 = vrot.slane %v1092_v52, 2  ;;  %v1113_v13 = vsel %vm717_vm4, %v1112_v5, %v1111_v3 }
  0xe9   :  { %v1057_v12 = vadd.f32 %v1056_v56, %v1055_v57  ;;  %v1118_v36 = vmul.f32 2.0, %v1044_v47  ;;  %v1097_v63 = vsub.f32 %v739_v18, %v882_v23  ;;  %v1115_v53 = vsel %vm719_vm5, %v1114_v7, %v1113_v13 }
  0xea   :  { %v1070_v26 = vadd.f32 %v1069_v16, %v1068_v54  ;;  %v1082_v31 = vrot.slane %v1081_v37, 1  ;;  %v1094_v51 = vadd.f32 %v1093_v38, %v1092_v52 }
  0xeb   :  { %v1119_v15 = vmul.f32 2.0, %v1057_v12  ;;  %v1117_v19 = vsub.f32 %v1097_v63, %v1115_v53 }
  0xec   :  { %v1083_v0 = vadd.f32 %v1082_v31, %v1081_v37  ;;  %v1095_v46 = vrot.slane %v1094_v51, 1  ;;  %v1120_v49 = vmul.f32 2.0, %v1070_v26 }
  0xed   :  { %v1128_v8 = vsel %vm713_vm2, %v1119_v15, %v1118_v36 }
  0xee   :  { %v1096_v17 = vadd.f32 %v1095_v46, %v1094_v51  ;;  %v1121_v60 = vmul.f32 2.0, %v1083_v0  ;;  %v1129_v11 = vsel %vm715_vm3, %v1120_v49, %v1128_v8 }
  0xf0   :  { %v1122_v4 = vmul.f32 2.0, %v1096_v17  ;;  %v1130_v14 = vsel %vm717_vm4, %v1121_v60, %v1129_v11 }
  0xf2   :  { %v1131_v50 = vsel %vm719_vm5, %v1122_v4, %v1130_v14 }
  0xf3   :  { %v1133_v25 = vadd.f32 %v1131_v50, %v1117_v19 }
  0xf5   :  { %v1135_v29 = vadd.f32 %v1134_v48, %v1133_v25 }
  0xf7   :  { %1138 = vst.msk [vmem:[#allocation2 + $0x1] sm:$0x1f] %vm82_vm1, %v1135_v29 }
  0xf8   :  { %1220 = shalt.err (!%p1217_p4)
}
  0xf9   :  { %1148 = dma.vmem_to_hbm [thread:$0]  %s1146_s19, 128, %s2417_s5, [#allocation3]  }
  0xfa   :  { %1229 = dma.done.wait [#allocation3], 128  }
  0xfb   :  { %1230 = vsyncadd [#allocation3], 4294967168 }
  0xfc   :  { %1152 = vsyncpa [#allocation3], 1 }

</bundles_post_ra>
